<compile_context>
chip_gen: v5e
topology: v5e:2x2
jax: 0.10.0
libtpu: 0.0.40
codegen_flags: <defaults>
</compile_context>

<pallas_src>
import jax
import jax.numpy as jnp
from jax import lax
from jax.experimental import pallas as pl
from jax.experimental.pallas import tpu as pltpu

_SELU_ALPHA = 1.6732632423543772848170429916717
_SELU_SCALE = 1.0507009873554804934193349852946
_BN_EPS = 1e-5


def _selu(x):
    # exp(min(x, 0)) keeps the discarded branch finite (safe if ever differentiated).
    return _SELU_SCALE * jnp.where(
        x > 0, x, _SELU_ALPHA * (jnp.exp(jnp.minimum(x, 0.0)) - 1.0))


def _block_kernel(x_ref, p1_ref, p2_ref, m1_ref, m2_ref, o_ref, pad1_ref, pad2_ref):
    # x_ref  : (TB, H, W*Cin)        one block of TB (batch*depth) slices, channels fastest
    # p1_ref : (2, W*Cin)            rows = [bn1 scale, bn1 shift]   (tiled across W)
    # p2_ref : (4, W*Cout)           rows = [conv1 bias, bn2 scale, bn2 shift, conv2 bias]
    # m1_ref : (K*W*Cin,  W*Cout)    fused banded block-Toeplitz conv1 weights
    # m2_ref : (K*W*Cout, W*Cout)    fused banded block-Toeplitz conv2 weights
    # o_ref  : (TB, H, W*Cout)
    # pad?_ref: (TB, H+2p, W*C)      H-padded staging scratch (persists across grid steps)
    TB, H, WCin = x_ref.shape
    WCout = o_ref.shape[2]
    K = m1_ref.shape[0] // WCin
    p = (K - 1) // 2
    mxu_dtype = m1_ref.dtype

    s1 = p1_ref[0:1, :]
    t1 = p1_ref[1:2, :]
    b1 = p2_ref[0:1, :]
    s2 = p2_ref[1:2, :]
    t2 = p2_ref[2:3, :]
    b2 = p2_ref[3:4, :]

    # The 2*p H-boundary rows of the staging buffers are zero for EVERY grid step and are
    # never touched by the interior write, so write them once (scratch persists).
    if p > 0:
        @pl.when(pl.program_id(0) == 0)
        def _():
            pad1_ref[:, :p, :] = jnp.zeros((TB, p, WCin), mxu_dtype)
            pad1_ref[:, p + H:, :] = jnp.zeros((TB, p, WCin), mxu_dtype)
            pad2_ref[:, :p, :] = jnp.zeros((TB, p, WCout), mxu_dtype)
            pad2_ref[:, p + H:, :] = jnp.zeros((TB, p, WCout), mxu_dtype)

    # ---- BN1 (folded scale/shift) + SELU, f32 VPU math --------------------------------
    a1 = _selu(x_ref[...] * s1 + t1)                       # (TB, H, WCin) f32
    pad1_ref[:, p:p + H, :] = a1.astype(mxu_dtype)

    # ---- Conv1 as ONE matmul: im2row over the K kh-taps (lane concat of shifted views),
    #      contraction dim = K*W*Cin; W padding / kw sum live inside the banded weights.
    lhs1 = jnp.concatenate(
        [pad1_ref[:, kh:kh + H, :].reshape(TB * H, WCin) for kh in range(K)], axis=-1)
    y1 = jnp.dot(lhs1, m1_ref[...], preferred_element_type=jnp.float32) + b1  # (TB*H, WCout)

    # ---- BN2 + SELU --------------------------------------------------------------------
    a2 = _selu(y1 * s2 + t2)
    pad2_ref[:, p:p + H, :] = a2.reshape(TB, H, WCout).astype(mxu_dtype)

    # ---- Conv2 as one matmul, contraction dim = K*W*Cout --------------------------------
    lhs2 = jnp.concatenate(
        [pad2_ref[:, kh:kh + H, :].reshape(TB * H, WCout) for kh in range(K)], axis=-1)
    y2 = jnp.dot(lhs2, m2_ref[...], preferred_element_type=jnp.float32) + b2

    # Lane-dense store: last dim is W*Cout (a multiple of 128 at these sizes).
    o_ref[...] = y2.reshape(TB, H, WCout).astype(o_ref.dtype)


def _band_weights(w_hwio, w_dim, dtype):
    """Convert (K, K, Ci, Co) HWIO conv weights into one fused banded matrix.

    Per-tap matrices M[kh][wi*Ci + c, wo*Co + o] = w[kh, wi - wo + p, c, o] inside the
    band, 0 outside, stacked and reshaped to (K*W*Ci, W*Co) so that
        y[:, h, :] = concat_kh(x_pad[:, h + kh, :]) @ M_fused
    is exactly the SAME-padded 2-D conv (kw sum and W boundary handled by the band)."""
    K = w_hwio.shape[0]
    Ci, Co = w_hwio.shape[2], w_hwio.shape[3]
    p = (K - 1) // 2
    wi = jnp.arange(w_dim)[:, None]
    wo = jnp.arange(w_dim)[None, :]
    kw = wi - wo + p                                    # (W, W)
    valid = (kw >= 0) & (kw < K)
    kw_c = jnp.clip(kw, 0, K - 1)
    mats = []
    for kh in range(K):
        t = jnp.where(valid[:, :, None, None], w_hwio[kh][kw_c], 0.0)  # (W, W, Ci, Co)
        mats.append(jnp.transpose(t, (0, 2, 1, 3)).reshape(w_dim * Ci, w_dim * Co))
    return jnp.stack(mats).reshape(K * w_dim * Ci, w_dim * Co).astype(dtype)


def _vmem_bytes(tb, H, Hp, WCin, WCout, K, mxu_bytes):
    """Honest per-step VMEM estimate (review item: the old 'in+out' heuristic undercounted)."""
    f32 = 4
    inout = 2 * tb * H * WCin * f32 + 2 * tb * H * WCout * f32   # double-buffered blocks
    scratch = tb * Hp * (WCin + WCout) * mxu_bytes               # H-padded staging
    im2row = tb * H * K * (WCin + WCout) * mxu_bytes             # fused-matmul LHS values
    live = tb * H * (WCin + 3 * WCout) * f32                     # a1 / y1 / a2 / y2 values
    weights = 2 * K * (WCin + WCout) * WCout * mxu_bytes         # (double-buffered) m1+m2
    weights += 2 * (2 * WCin + 4 * WCout) * f32                  # pvec1 / pvec2
    return inout + scratch + im2row + live + weights


def _pick_tb(nd, H, Hp, WCin, WCout, K, mxu_bytes, budget_bytes):
    """Largest divisor of nd whose per-step footprint fits the budget.  No minimum step
    count: on single-TC v5e/v6e one big step is strictly better (see v7x TODO above)."""
    best = 1
    for cand in range(1, nd + 1):
        if nd % cand == 0 and _vmem_bytes(cand, H, Hp, WCin, WCout, K, mxu_bytes) <= budget_bytes:
            best = cand
    return best


def basic_cnn_block_3d_slices(x_slices, params, *, use_bf16_mxu=False):
    """Core entry point in the channels-last 'slices' layout.

    x_slices: (N*D, H, W*Cin) float32, channel fastest within the last dim.
    Returns  (N*D, H, W*Cout) float32.  Chained blocks should stay in this layout to
    avoid per-block HBM transpose passes."""
    ND, H, WCin = x_slices.shape
    w1, w2 = params["w1"], params["w2"]
    K, Cin, Cout = w1.shape[0], w1.shape[2], w1.shape[3]
    if K % 2 != 1:
        raise ValueError("banded 'same' conv construction requires an odd kernel_size")
    if WCin % Cin != 0:
        raise ValueError("last dim of x_slices must be W * in_channels")
    W = WCin // Cin
    WCout = W * Cout
    p = (K - 1) // 2
    Hp = H + 2 * p

    mxu_dtype = jnp.bfloat16 if use_bf16_mxu else jnp.float32
    mxu_bytes = 2 if use_bf16_mxu else 4

    # Fused banded weight matrices (cheap one-time XLA prep).
    m1 = _band_weights(w1, W, mxu_dtype)                # (K*W*Cin,  W*Cout)
    m2 = _band_weights(w2, W, mxu_dtype)                # (K*W*Cout, W*Cout)

    # Per-channel params tiled across W to match the (w*C + c) lane layout, packed into
    # two small arrays (fewer tiny DMA descriptors per step).  Elementwise math stays f32.
    pvec1 = jnp.stack([jnp.tile(params["scale1"], W),
                       jnp.tile(params["shift1"], W)]).astype(jnp.float32)   # (2, W*Cin)
    pvec2 = jnp.stack([jnp.tile(params["b1"], W),
                       jnp.tile(params["scale2"], W),
                       jnp.tile(params["shift2"], W),
                       jnp.tile(params["b2"], W)]).astype(jnp.float32)       # (4, W*Cout)

    # Block batching against an honest VMEM budget (headroom under v7x's 64 MiB physical).
    budget = 24 << 20
    TB = _pick_tb(ND, H, Hp, WCin, WCout, K, mxu_bytes, budget)
    grid = (ND // TB,)
    est = _vmem_bytes(TB, H, Hp, WCin, WCout, K, mxu_bytes)
    vmem_limit = int(min(64 << 20, max(32 << 20, 2 * est)))

    x_slices = x_slices.astype(jnp.float32)

    # NOTE: pvec/m specs are grid-invariant; if the grid ever has many steps and the
    # banded weights grow (W^2 scaling of m2), single-buffer them (pl.Buffered(1)) or
    # stage them once via memory_space=pl.ANY to reclaim the duplicate pipeline buffer.
    out = pl.pallas_call(
        _block_kernel,
        out_shape=jax.ShapeDtypeStruct((ND, H, WCout), jnp.float32),
        grid_spec=pltpu.PrefetchScalarGridSpec(
            num_scalar_prefetch=0,
            grid=grid,
            in_specs=[
                pl.BlockSpec((TB, H, WCin), lambda n: (n, 0, 0)),
                pl.BlockSpec(pvec1.shape, lambda n: (0, 0)),
                pl.BlockSpec(pvec2.shape, lambda n: (0, 0)),
                pl.BlockSpec(m1.shape, lambda n: (0, 0)),
                pl.BlockSpec(m2.shape, lambda n: (0, 0)),
            ],
            out_specs=pl.BlockSpec((TB, H, WCout), lambda n: (n, 0, 0)),
            scratch_shapes=[
                pltpu.VMEM((TB, Hp, WCin), mxu_dtype),    # conv1 H-padded staging
                pltpu.VMEM((TB, Hp, WCout), mxu_dtype),   # conv2 H-padded staging
            ],
        ),
        compiler_params=pltpu.CompilerParams(
            dimension_semantics=("parallel",),
            vmem_limit_bytes=vmem_limit,
        ),
    )(x_slices, pvec1, pvec2, m1, m2)
    return out


def basic_cnn_block_3d(x_ncdhw, params, *, use_bf16_mxu=False):
    """PyTorch-layout wrapper.  x_ncdhw: (N, Cin, D, H, W) float32 -> (N, Cout, D, H, W).

    Each transpose below is a full HBM read+write pass; a chain of blocks should instead
    use basic_cnn_block_3d_slices and only convert layout at the model boundary."""
    N, Cin, D, H, W = x_ncdhw.shape
    Cout = params["w1"].shape[3]
    x = jnp.transpose(x_ncdhw, (0, 2, 3, 4, 1)).reshape(N * D, H, W * Cin)
    out = basic_cnn_block_3d_slices(x, params, use_bf16_mxu=use_bf16_mxu)
    return jnp.transpose(out.reshape(N, D, H, W, Cout), (0, 4, 1, 2, 3))


def _reference(x_ncdhw, params):
    """Pure-JAX reference (lax conv) with identical semantics, for validation."""
    N, Cin, D, H, W = x_ncdhw.shape
    Cout = params["w1"].shape[3]
    x = jnp.transpose(x_ncdhw, (0, 2, 3, 4, 1)).reshape(N * D, H, W, Cin)
    x = x.astype(jnp.float32)

    a1 = _selu(x * params["scale1"] + params["shift1"])
    y1 = lax.conv_general_dilated(
        a1, params["w1"], window_strides=(1, 1), padding="SAME",
        dimension_numbers=("NHWC", "HWIO", "NHWC")) + params["b1"]

    a2 = _selu(y1 * params["scale2"] + params["shift2"])
    y2 = lax.conv_general_dilated(
        a2, params["w2"], window_strides=(1, 1), padding="SAME",
        dimension_numbers=("NHWC", "HWIO", "NHWC")) + params["b2"]

    return jnp.transpose(y2.reshape(N, D, H, W, Cout), (0, 4, 1, 2, 3))


def make_params(key, in_channels, out_channels, kernel_size):
    """Deterministic synthetic parameters (BN folded to scale/shift, conv HWIO)."""
    ks = jax.random.split(key, 12)

    def bn_fold(kg, kb, km, kv, c):
        gamma = jax.random.uniform(kg, (c,), jnp.float32, 0.5, 1.5)
        beta = 0.1 * jax.random.normal(kb, (c,), jnp.float32)
        rmean = 0.1 * jax.random.normal(km, (c,), jnp.float32)
        rvar = jax.random.uniform(kv, (c,), jnp.float32, 0.5, 1.5)
        scale = gamma * lax.rsqrt(rvar + _BN_EPS)
        shift = beta - rmean * scale
        return scale, shift

    scale1, shift1 = bn_fold(ks[0], ks[1], ks[2], ks[3], in_channels)
    scale2, shift2 = bn_fold(ks[4], ks[5], ks[6], ks[7], out_channels)

    fan1 = in_channels * kernel_size * kernel_size
    fan2 = out_channels * kernel_size * kernel_size
    w1 = jax.random.normal(ks[8], (kernel_size, kernel_size, in_channels, out_channels),
                           jnp.float32) / jnp.sqrt(float(fan1))
    b1 = jax.random.uniform(ks[9], (out_channels,), jnp.float32,
                            -1.0 / jnp.sqrt(float(fan1)), 1.0 / jnp.sqrt(float(fan1)))
    w2 = jax.random.normal(ks[10], (kernel_size, kernel_size, out_channels, out_channels),
                           jnp.float32) / jnp.sqrt(float(fan2))
    b2 = jax.random.uniform(ks[11], (out_channels,), jnp.float32,
                            -1.0 / jnp.sqrt(float(fan2)), 1.0 / jnp.sqrt(float(fan2)))

    return dict(scale1=scale1, shift1=shift1, w1=w1, b1=b1,
                scale2=scale2, shift2=shift2, w2=w2, b2=b2)


if __name__ == "__main__":
    N, Cin, Cout, D, H, W, K = 2, 4, 8, 3, 16, 16, 3

    key = jax.random.PRNGKey(0)
    kx, kp = jax.random.split(key)
    x = jax.random.normal(kx, (N, Cin, D, H, W), jnp.float32)
    params = make_params(kp, Cin, Cout, K)

    ref = jax.block_until_ready(_reference(x, params))

    # f32 MXU path: tight parity with the f32 lax reference.
    out = jax.block_until_ready(basic_cnn_block_3d(x, params))
    assert out.shape == (N, Cout, D, H, W), out.shape
    assert jnp.allclose(out, ref, atol=1e-4, rtol=1e-4), float(jnp.max(jnp.abs(out - ref)))

    # bf16 MXU-operand path (review item): ~2x MXU on v6e/v7x, f32 accumulation, looser tol.
    out_bf16 = jax.block_until_ready(basic_cnn_block_3d(x, params, use_bf16_mxu=True))
    assert jnp.allclose(out_bf16, ref, atol=5e-2, rtol=5e-2), \
        float(jnp.max(jnp.abs(out_bf16 - ref)))

    print("KERNEL_OK")
</pallas_src>

<mosaic_0001>
module attributes {stable_mosaic.version = 11 : i64} {
  func.func @_block_kernel(%arg0: i32, %arg1: memref<6x16x64xf32, #tpu.memory_space<vmem>>, %arg2: memref<2x64xf32, #tpu.memory_space<vmem>>, %arg3: memref<4x128xf32, #tpu.memory_space<vmem>>, %arg4: memref<192x128xf32, #tpu.memory_space<vmem>>, %arg5: memref<384x128xf32, #tpu.memory_space<vmem>>, %arg6: memref<6x16x128xf32, #tpu.memory_space<vmem>>, %arg7: memref<6x18x64xf32, #tpu.memory_space<vmem>>, %arg8: memref<6x18x128xf32, #tpu.memory_space<vmem>>) attributes {dimension_semantics = [#tpu.dimension_semantics<parallel>], iteration_bounds = array<i64: 1>, scalar_prefetch = 0 : i64, scratch_operands = 2 : i64, tpu.core_type = #tpu.core_type<tc>, window_params = [{transform_indices = @transform_0, window_bounds = array<i64: 6, 16, 64>}, {pipeline_mode = #tpu.pipeline_mode<synchronous>, transform_indices = @transform_1, window_bounds = array<i64: 2, 64>}, {pipeline_mode = #tpu.pipeline_mode<synchronous>, transform_indices = @transform_2, window_bounds = array<i64: 4, 128>}, {pipeline_mode = #tpu.pipeline_mode<synchronous>, transform_indices = @transform_3, window_bounds = array<i64: 192, 128>}, {pipeline_mode = #tpu.pipeline_mode<synchronous>, transform_indices = @transform_4, window_bounds = array<i64: 384, 128>}, {transform_indices = @transform_5, window_bounds = array<i64: 6, 16, 128>}]} {
    %c0 = arith.constant 0 : index
    %c0_0 = arith.constant 0 : index
    %0 = vector.load %arg2[%c0, %c0_0] : memref<2x64xf32, #tpu.memory_space<vmem>>, vector<1x64xf32>
    %c1 = arith.constant 1 : index
    %c0_1 = arith.constant 0 : index
    %1 = vector.load %arg2[%c1, %c0_1] : memref<2x64xf32, #tpu.memory_space<vmem>>, vector<1x64xf32>
    %c0_2 = arith.constant 0 : index
    %c0_3 = arith.constant 0 : index
    %2 = vector.load %arg3[%c0_2, %c0_3] : memref<4x128xf32, #tpu.memory_space<vmem>>, vector<1x128xf32>
    %c1_4 = arith.constant 1 : index
    %c0_5 = arith.constant 0 : index
    %3 = vector.load %arg3[%c1_4, %c0_5] : memref<4x128xf32, #tpu.memory_space<vmem>>, vector<1x128xf32>
    %c2 = arith.constant 2 : index
    %c0_6 = arith.constant 0 : index
    %4 = vector.load %arg3[%c2, %c0_6] : memref<4x128xf32, #tpu.memory_space<vmem>>, vector<1x128xf32>
    %c3 = arith.constant 3 : index
    %c0_7 = arith.constant 0 : index
    %5 = vector.load %arg3[%c3, %c0_7] : memref<4x128xf32, #tpu.memory_space<vmem>>, vector<1x128xf32>
    %c0_i32 = arith.constant 0 : i32
    %6 = arith.cmpi eq, %arg0, %c0_i32 : i32
    %7 = arith.extui %6 : i1 to i32
    %c0_i32_8 = arith.constant 0 : i32
    %8 = arith.cmpi ne, %7, %c0_i32_8 : i32
    scf.if %8 {
      %cst_54 = arith.constant 0.000000e+00 : f32
      %71 = vector.broadcast %cst_54 : f32 to vector<6x1x64xf32>
      %c0_55 = arith.constant 0 : index
      %c0_56 = arith.constant 0 : index
      %c0_57 = arith.constant 0 : index
      %72 = vector.load %arg7[%c0_55, %c0_56, %c0_57] : memref<6x18x64xf32, #tpu.memory_space<vmem>>, vector<6x1x64xf32>
      tpu.vector_store %arg7[%c0_55, %c0_56, %c0_57], %71 {strides = array<i32>} : memref<6x18x64xf32, #tpu.memory_space<vmem>>, vector<6x1x64xf32>,
      %cst_58 = arith.constant 0.000000e+00 : f32
      %73 = vector.broadcast %cst_58 : f32 to vector<6x1x64xf32>
      %c0_59 = arith.constant 0 : index
      %c17 = arith.constant 17 : index
      %c0_60 = arith.constant 0 : index
      %74 = vector.load %arg7[%c0_59, %c17, %c0_60] : memref<6x18x64xf32, #tpu.memory_space<vmem>>, vector<6x1x64xf32>
      tpu.vector_store %arg7[%c0_59, %c17, %c0_60], %73 {strides = array<i32>} : memref<6x18x64xf32, #tpu.memory_space<vmem>>, vector<6x1x64xf32>,
      %cst_61 = arith.constant 0.000000e+00 : f32
      %75 = vector.broadcast %cst_61 : f32 to vector<6x1x128xf32>
      %c0_62 = arith.constant 0 : index
      %c0_63 = arith.constant 0 : index
      %c0_64 = arith.constant 0 : index
      %76 = vector.load %arg8[%c0_62, %c0_63, %c0_64] : memref<6x18x128xf32, #tpu.memory_space<vmem>>, vector<6x1x128xf32>
      tpu.vector_store %arg8[%c0_62, %c0_63, %c0_64], %75 {strides = array<i32>} : memref<6x18x128xf32, #tpu.memory_space<vmem>>, vector<6x1x128xf32>,
      %cst_65 = arith.constant 0.000000e+00 : f32
      %77 = vector.broadcast %cst_65 : f32 to vector<6x1x128xf32>
      %c0_66 = arith.constant 0 : index
      %c17_67 = arith.constant 17 : index
      %c0_68 = arith.constant 0 : index
      %78 = vector.load %arg8[%c0_66, %c17_67, %c0_68] : memref<6x18x128xf32, #tpu.memory_space<vmem>>, vector<6x1x128xf32>
      tpu.vector_store %arg8[%c0_66, %c17_67, %c0_68], %77 {strides = array<i32>} : memref<6x18x128xf32, #tpu.memory_space<vmem>>, vector<6x1x128xf32>,
    } else {
    }
    %c0_9 = arith.constant 0 : index
    %c0_10 = arith.constant 0 : index
    %c0_11 = arith.constant 0 : index
    %9 = vector.load %arg1[%c0_9, %c0_10, %c0_11] : memref<6x16x64xf32, #tpu.memory_space<vmem>>, vector<6x16x64xf32>
    %10 = vector.shape_cast %0 : vector<1x64xf32> to vector<1x1x64xf32>
    %11 = vector.broadcast %10 : vector<1x1x64xf32> to vector<6x16x64xf32>
    %12 = arith.mulf %9, %11 : vector<6x16x64xf32>
    %13 = vector.shape_cast %1 : vector<1x64xf32> to vector<1x1x64xf32>
    %14 = vector.broadcast %13 : vector<1x1x64xf32> to vector<6x16x64xf32>
    %15 = arith.addf %12, %14 : vector<6x16x64xf32>
    %cst = arith.constant 0.000000e+00 : f32
    %16 = vector.broadcast %cst : f32 to vector<6x16x64xf32>
    %17 = arith.cmpf ogt, %15, %16 : vector<6x16x64xf32>
    %cst_12 = arith.constant 0.000000e+00 : f32
    %18 = vector.broadcast %cst_12 : f32 to vector<6x16x64xf32>
    %19 = arith.minimumf %15, %18 : vector<6x16x64xf32>
    %20 = math.exp %19 : vector<6x16x64xf32>
    %cst_13 = arith.constant 1.000000e+00 : f32
    %21 = vector.broadcast %cst_13 : f32 to vector<6x16x64xf32>
    %22 = arith.subf %20, %21 : vector<6x16x64xf32>
    %cst_14 = arith.constant 1.67326319 : f32
    %23 = vector.broadcast %cst_14 : f32 to vector<6x16x64xf32>
    %24 = arith.mulf %23, %22 : vector<6x16x64xf32>
    %25 = arith.select %17, %15, %24 : vector<6x16x64xi1>, vector<6x16x64xf32>
    %cst_15 = arith.constant 1.05070102 : f32
    %26 = vector.broadcast %cst_15 : f32 to vector<6x16x64xf32>
    %27 = arith.mulf %26, %25 : vector<6x16x64xf32>
    %c0_16 = arith.constant 0 : index
    %c1_17 = arith.constant 1 : index
    %c0_18 = arith.constant 0 : index
    %28 = vector.load %arg7[%c0_16, %c1_17, %c0_18] : memref<6x18x64xf32, #tpu.memory_space<vmem>>, vector<6x16x64xf32>
    tpu.vector_store %arg7[%c0_16, %c1_17, %c0_18], %27 {strides = array<i32>} : memref<6x18x64xf32, #tpu.memory_space<vmem>>, vector<6x16x64xf32>,
    %c0_19 = arith.constant 0 : index
    %c0_20 = arith.constant 0 : index
    %c0_21 = arith.constant 0 : index
    %29 = vector.load %arg7[%c0_19, %c0_20, %c0_21] : memref<6x18x64xf32, #tpu.memory_space<vmem>>, vector<6x16x64xf32>
    %30 = vector.shape_cast %29 : vector<6x16x64xf32> to vector<96x64xf32>
    %c0_22 = arith.constant 0 : index
    %c1_23 = arith.constant 1 : index
    %c0_24 = arith.constant 0 : index
    %31 = vector.load %arg7[%c0_22, %c1_23, %c0_24] : memref<6x18x64xf32, #tpu.memory_space<vmem>>, vector<6x16x64xf32>
    %32 = vector.shape_cast %31 : vector<6x16x64xf32> to vector<96x64xf32>
    %c0_25 = arith.constant 0 : index
    %c2_26 = arith.constant 2 : index
    %c0_27 = arith.constant 0 : index
    %33 = vector.load %arg7[%c0_25, %c2_26, %c0_27] : memref<6x18x64xf32, #tpu.memory_space<vmem>>, vector<6x16x64xf32>
    %34 = vector.shape_cast %33 : vector<6x16x64xf32> to vector<96x64xf32>
    %35 = tpu.concatenate %30, %32, %34 in 1 : vector<96x64xf32>, vector<96x64xf32>, vector<96x64xf32> -> vector<96x192xf32>
    %c0_28 = arith.constant 0 : index
    %c0_29 = arith.constant 0 : index
    %36 = vector.load %arg4[%c0_28, %c0_29] : memref<192x128xf32, #tpu.memory_space<vmem>>, vector<192x128xf32>
    %cst_30 = arith.constant dense<0.000000e+00> : vector<96x128xf32>
    %37 = tpu.matmul %35, %36, %cst_30 {dimension_numbers = #tpu.dot_dimension_numbers<[1], [0], [0], [1], [0, 0, 1, 1], [], []>} : vector<96x192xf32>, vector<192x128xf32>, vector<96x128xf32> -> vector<96x128xf32>
    %38 = vector.broadcast %2 : vector<1x128xf32> to vector<96x128xf32>
    %39 = arith.addf %37, %38 : vector<96x128xf32>
    %40 = vector.broadcast %3 : vector<1x128xf32> to vector<96x128xf32>
    %41 = arith.mulf %39, %40 : vector<96x128xf32>
    %42 = vector.broadcast %4 : vector<1x128xf32> to vector<96x128xf32>
    %43 = arith.addf %41, %42 : vector<96x128xf32>
    %cst_31 = arith.constant 0.000000e+00 : f32
    %44 = vector.broadcast %cst_31 : f32 to vector<96x128xf32>
    %45 = arith.cmpf ogt, %43, %44 : vector<96x128xf32>
    %cst_32 = arith.constant 0.000000e+00 : f32
    %46 = vector.broadcast %cst_32 : f32 to vector<96x128xf32>
    %47 = arith.minimumf %43, %46 : vector<96x128xf32>
    %48 = math.exp %47 : vector<96x128xf32>
    %cst_33 = arith.constant 1.000000e+00 : f32
    %49 = vector.broadcast %cst_33 : f32 to vector<96x128xf32>
    %50 = arith.subf %48, %49 : vector<96x128xf32>
    %cst_34 = arith.constant 1.67326319 : f32
    %51 = vector.broadcast %cst_34 : f32 to vector<96x128xf32>
    %52 = arith.mulf %51, %50 : vector<96x128xf32>
    %53 = arith.select %45, %43, %52 : vector<96x128xi1>, vector<96x128xf32>
    %cst_35 = arith.constant 1.05070102 : f32
    %54 = vector.broadcast %cst_35 : f32 to vector<96x128xf32>
    %55 = arith.mulf %54, %53 : vector<96x128xf32>
    %56 = vector.shape_cast %55 : vector<96x128xf32> to vector<6x16x128xf32>
    %c0_36 = arith.constant 0 : index
    %c1_37 = arith.constant 1 : index
    %c0_38 = arith.constant 0 : index
    %57 = vector.load %arg8[%c0_36, %c1_37, %c0_38] : memref<6x18x128xf32, #tpu.memory_space<vmem>>, vector<6x16x128xf32>
    tpu.vector_store %arg8[%c0_36, %c1_37, %c0_38], %56 {strides = array<i32>} : memref<6x18x128xf32, #tpu.memory_space<vmem>>, vector<6x16x128xf32>,
    %c0_39 = arith.constant 0 : index
    %c0_40 = arith.constant 0 : index
    %c0_41 = arith.constant 0 : index
    %58 = vector.load %arg8[%c0_39, %c0_40, %c0_41] : memref<6x18x128xf32, #tpu.memory_space<vmem>>, vector<6x16x128xf32>
    %59 = vector.shape_cast %58 : vector<6x16x128xf32> to vector<96x128xf32>
    %c0_42 = arith.constant 0 : index
    %c1_43 = arith.constant 1 : index
    %c0_44 = arith.constant 0 : index
    %60 = vector.load %arg8[%c0_42, %c1_43, %c0_44] : memref<6x18x128xf32, #tpu.memory_space<vmem>>, vector<6x16x128xf32>
    %61 = vector.shape_cast %60 : vector<6x16x128xf32> to vector<96x128xf32>
    %c0_45 = arith.constant 0 : index
    %c2_46 = arith.constant 2 : index
    %c0_47 = arith.constant 0 : index
    %62 = vector.load %arg8[%c0_45, %c2_46, %c0_47] : memref<6x18x128xf32, #tpu.memory_space<vmem>>, vector<6x16x128xf32>
    %63 = vector.shape_cast %62 : vector<6x16x128xf32> to vector<96x128xf32>
    %64 = tpu.concatenate %59, %61, %63 in 1 : vector<96x128xf32>, vector<96x128xf32>, vector<96x128xf32> -> vector<96x384xf32>
    %c0_48 = arith.constant 0 : index
    %c0_49 = arith.constant 0 : index
    %65 = vector.load %arg5[%c0_48, %c0_49] : memref<384x128xf32, #tpu.memory_space<vmem>>, vector<384x128xf32>
    %cst_50 = arith.constant dense<0.000000e+00> : vector<96x128xf32>
    %66 = tpu.matmul %64, %65, %cst_50 {dimension_numbers = #tpu.dot_dimension_numbers<[1], [0], [0], [1], [0, 0, 1, 1], [], []>} : vector<96x384xf32>, vector<384x128xf32>, vector<96x128xf32> -> vector<96x128xf32>
    %67 = vector.broadcast %5 : vector<1x128xf32> to vector<96x128xf32>
    %68 = arith.addf %66, %67 : vector<96x128xf32>
    %69 = vector.shape_cast %68 : vector<96x128xf32> to vector<6x16x128xf32>
    %c0_51 = arith.constant 0 : index
    %c0_52 = arith.constant 0 : index
    %c0_53 = arith.constant 0 : index
    %70 = vector.load %arg6[%c0_51, %c0_52, %c0_53] : memref<6x16x128xf32, #tpu.memory_space<vmem>>, vector<6x16x128xf32>
    tpu.vector_store %arg6[%c0_51, %c0_52, %c0_53], %69 {strides = array<i32>} : memref<6x16x128xf32, #tpu.memory_space<vmem>>, vector<6x16x128xf32>,
    return
  }
  func.func @transform_0(%arg0: i32) -> (i32, i32, i32) {
    %c0_i32 = arith.constant 0 : i32
    %c0_i32_0 = arith.constant 0 : i32
    %c0_i32_1 = arith.constant 0 : i32
    return %arg0, %c0_i32, %c0_i32_0 : i32, i32, i32
  }
  func.func @transform_1(%arg0: i32) -> (i32, i32) {
    %c0_i32 = arith.constant 0 : i32
    %c0_i32_0 = arith.constant 0 : i32
    %c0_i32_1 = arith.constant 0 : i32
    return %c0_i32, %c0_i32_0 : i32, i32
  }
  func.func @transform_2(%arg0: i32) -> (i32, i32) {
    %c0_i32 = arith.constant 0 : i32
    %c0_i32_0 = arith.constant 0 : i32
    %c0_i32_1 = arith.constant 0 : i32
    return %c0_i32, %c0_i32_0 : i32, i32
  }
  func.func @transform_3(%arg0: i32) -> (i32, i32) {
    %c0_i32 = arith.constant 0 : i32
    %c0_i32_0 = arith.constant 0 : i32
    %c0_i32_1 = arith.constant 0 : i32
    return %c0_i32, %c0_i32_0 : i32, i32
  }
  func.func @transform_4(%arg0: i32) -> (i32, i32) {
    %c0_i32 = arith.constant 0 : i32
    %c0_i32_0 = arith.constant 0 : i32
    %c0_i32_1 = arith.constant 0 : i32
    return %c0_i32, %c0_i32_0 : i32, i32
  }
  func.func @transform_5(%arg0: i32) -> (i32, i32, i32) {
    %c0_i32 = arith.constant 0 : i32
    %c0_i32_0 = arith.constant 0 : i32
    %c0_i32_1 = arith.constant 0 : i32
    return %arg0, %c0_i32, %c0_i32_0 : i32, i32, i32
  }
}

</mosaic_0001>

<bundles_post_ra>
// kernel: tpu_custom_call.1
= control target key start
LH: loop header
LB: loop body
LE: loop exit
PB: predicated region body
PF: predicated region fallthrough
CT: control target
= control target key end

     0   :  { %10 = vsyncpa [#allocation5], 0  ;;  %s1546_s0 = inlined_call_operand.hbm [shape: f32[6,16,64], index: 0, kind: input, shape index: {}]   ;;  %s1547_s1 = inlined_call_operand.hbm [shape: f32[2,64], index: 1, kind: input, shape index: {}]   ;;  %s1548_s2 = inlined_call_operand.hbm [shape: f32[4,128], index: 2, kind: input, shape index: {}]   ;;  %s1549_s3 = inlined_call_operand.hbm [shape: f32[192,128], index: 3, kind: input, shape index: {}]   ;;  %s1550_s4 = inlined_call_operand.hbm [shape: f32[384,128], index: 4, kind: input, shape index: {}]   ;;  %s1551_s5 = inlined_call_operand.hbm [shape: f32[6,16,128], index: 5, kind: output, shape index: {}]  }
   0x1   :  { %11 = vsyncpa [#allocation8], 0 }
   0x2   :  { %12 = vsyncpa [#allocation11], 0  ;;  %s32_s20 = sshll.u32 %s1547_s1, 4  ;;  %s33_s20 = int_to_ptr.hbm [resolvable:$true] %s32_s20 }
   0x3   :  { %13 = vsyncpa [#allocation6], 0  ;;  %s1227_s21 = smov [#allocation7]   ;;  %s53_s25 = sshll.u32 %s1549_s3, 4  ;;  %s54_s25 = int_to_ptr.hbm [resolvable:$true] %s53_s25 }
   0x4   :  { %s34_s22 = sshll.u32 %s1227_s21, 4  ;;  %s1228_s26 = smov [#allocation10]   ;;  %s35_s22 = int_to_ptr.vmem [resolvable:$true] %s34_s22 }
   0x5   :  { %37 = dma.hbm_to_vmem [thread:$0]  %s33_s20, 32, %s35_s22, [#allocation8]  }
   0x6   :  { %s55_s27 = sshll.u32 %s1228_s26, 4  ;;  %s18_s30 = sshll.u32 %s1546_s0, 4  ;;  %s56_s27 = int_to_ptr.vmem [resolvable:$true] %s55_s27  ;;  %s19_s30 = int_to_ptr.hbm [resolvable:$true] %s18_s30 }
   0x7   :  { %s1229_s1 = smov 128   ;;  %s1230_s6 = smov 8  }
   0x8   :  { %61 = dma.hbm_to_vmem [thread:$0]  %s54_s25, 3072, %s56_s27, [#allocation11], %s1229_s1, %s1229_s1, %s1230_s6  }
   0x9   :  { %s43_s9 = sshll.u32 %s1548_s2, 4  ;;  %s1231_s3 = smov [#allocation4]   ;;  %s44_s9 = int_to_ptr.hbm [resolvable:$true] %s43_s9 }
   0xa   :  { %s20_s10 = sshll.u32 %s1231_s3, 4  ;;  %s1232_s0 = smov [#allocation9]   ;;  %s21_s10 = int_to_ptr.vmem [resolvable:$true] %s20_s10 }
   0xb   :  { %26 = dma.hbm_to_vmem [thread:$0]  %s19_s30, 1536, %s21_s10, [#allocation5], %s1229_s1, %s1229_s1, %s1230_s6  }
   0xc   :  { %s45_s11 = sshll.u32 %s1232_s0, 4  ;;  %s66_s14 = sshll.u32 %s1550_s4, 4  ;;  %s46_s11 = int_to_ptr.vmem [resolvable:$true] %s45_s11  ;;  %s67_s14 = int_to_ptr.hbm [resolvable:$true] %s66_s14 }
   0xd   :  { %48 = dma.hbm_to_vmem [thread:$0]  %s44_s9, 64, %s46_s11, [#allocation8]  }
   0xe   :  { %s1233_s15 = smov [#allocation12]  }
   0xf   :  { %s68_s16 = sshll.u32 %s1233_s15, 4  ;;  %s69_s16 = int_to_ptr.vmem [resolvable:$true] %s68_s16 }
  0x10   :  { %74 = dma.hbm_to_vmem [thread:$0]  %s67_s14, 6144, %s69_s16, [#allocation11], %s1229_s1, %s1229_s1, %s1230_s6  }
  0x11   :  { %1219 = dma.done.wait [#allocation5], 1536  }
  0x12   :  { %1220 = vsyncadd [#allocation5], 4294965760 }
  0x13   :  { %1221 = dma.done.wait [#allocation8], 96  }
  0x14   :  { %1222 = vsyncadd [#allocation8], 4294967200 }
  0x15   :  { %1223 = dma.done.wait [#allocation11], 9216  }
  0x16   :  { %1224 = vsyncadd [#allocation11], 4294958080  ;;  %v130_v0 = vld [vmem:[#allocation4] sm:$0xff]  ;;  %v131_v3 = vld [vmem:[#allocation4 + $0x8] sm:$0xff]  ;;  %vm264_vm0 = vcmask 523264   ;;  %s1234_s2 = smov 64  }
  0x17   :  { %v1291_v1 = vld [vmem:[#allocation7] ss:$0 sm:$0xff]  ;;  %v1293_v2 = vld [vmem:[#allocation7 + $0x1] ss:$0 sm:$0xff]  ;;  %v132_v4 = vld [vmem:[#allocation4 + $0x10] sm:$0xff]  ;;  %vm105_vm13 = vcmask 516096  }
  0x18   :  { %v133_v5 = vld [vmem:[#allocation4 + $0x18] sm:$0xff]  ;;  %v143_v6 = vmul.f32 %v1291_v1, %v130_v0  ;;  %v144_v7 = vmul.f32 %v1291_v1, %v131_v3  ;;  %v145_v8 = vmul.f32 %v1291_v1, %v132_v4  ;;  %v136_v22 = vld [vmem:[#allocation4 + $0x30] sm:$0xff]  ;;  %v134_v27 = vld [vmem:[#allocation4 + $0x20] sm:$0xff]  ;;  %s1236_s4 = smov [#allocation13]   ;;  %s936_s20 = sshll.u32 %s1551_s5, 4  ;;  %s937_s20 = int_to_ptr.hbm [resolvable:$true] %s936_s20 }
  0x19   :  { %v146_v9 = vmul.f32 %v1291_v1, %v133_v5  ;;  %v149_v23 = vmul.f32 %v1291_v1, %v136_v22  ;;  %v137_v28 = vld [vmem:[#allocation4 + $0x38] sm:$0xff]  ;;  %v147_v32 = vmul.f32 %v1291_v1, %v134_v27  ;;  %v135_v36 = vld [vmem:[#allocation4 + $0x28] sm:$0xff]  ;;  %v140_v60 = vld [vmem:[#allocation4 + $0x50] sm:$0xff]  ;;  %s934_s17 = sshll.u32 %s1236_s4, 4  ;;  %s935_s17 = int_to_ptr.vmem [resolvable:$true] %s934_s17 }
  0x1a   :  { %v156_v10 = vadd.f32 %v1293_v2, %v143_v6  ;;  %v157_v11 = vadd.f32 %v1293_v2, %v144_v7  ;;  %v158_v12 = vadd.f32 %v1293_v2, %v145_v8  ;;  %v150_v33 = vmul.f32 %v1291_v1, %v137_v28  ;;  %v139_v55 = vld [vmem:[#allocation4 + $0x48] sm:$0xff]  ;;  %v388_v6 = vld [vmem:[#allocation10 + $0x78] sm:$0xff]  ;;  %v387_v7 = vld [vmem:[#allocation10 + $0x70] sm:$0xff] }
  0x1b   :  { %v159_v13 = vadd.f32 %v1293_v2, %v146_v9  ;;  %v1305_v24 = vadd.f32 %v1293_v2, %v149_v23  ;;  %v1311_v40 = vadd.f32 %v1293_v2, %v147_v32  ;;  %v148_v44 = vmul.f32 %v1291_v1, %v135_v36  ;;  %434 = vmatpush.msra.mxu0 %v388_v6  ;;  %v138_v9 = vld [vmem:[#allocation4 + $0x40] sm:$0xff]  ;;  %v386_v22 = vld [vmem:[#allocation10 + $0x68] sm:$0xff]  ;;  %v383_v32 = vld [vmem:[#allocation10 + $0x50] sm:$0xff] }
  0x1c   :  { %v180_v14 = vmin.f32 %v156_v10, 0.0  ;;  %v181_v15 = vmin.f32 %v157_v11, 0.0  ;;  %v182_v16 = vmin.f32 %v158_v12, 0.0  ;;  %vm168_vm1 = vcmp.gt.f32.partialorder %v156_v10, 0.0  ;;  %v384_v28 = vld [vmem:[#allocation10 + $0x58] sm:$0xff] }
  0x1d   :  { %v183_v17 = vmin.f32 %v159_v13, 0.0  ;;  %v186_v25 = vmin.f32 %v1305_v24, 0.0  ;;  %vm169_vm2 = vcmp.gt.f32.partialorder %v157_v11, 0.0  ;;  %vm170_vm3 = vcmp.gt.f32.partialorder %v158_v12, 0.0  ;;  %435 = vmatpush.msra.mxu0 %v387_v7  ;;  %v141_v36 = vld [vmem:[#allocation4 + $0x58] sm:$0xff] }
  0x1e   :  { %v192_v18 = vmul.f32 1.442695, %v180_v14  ;;  %v194_v19 = vmul.f32 1.442695, %v181_v15  ;;  %v196_v20 = vmul.f32 1.442695, %v182_v16  ;;  %v1314_v43 = vadd.f32 %v1293_v2, %v150_v33 }
  0x1f   :  { %v198_v21 = vmul.f32 1.442695, %v183_v17  ;;  %v204_v31 = vmul.f32 1.442695, %v186_v25  ;;  %vm171_vm4 = vcmp.gt.f32.partialorder %v159_v13, 0.0  ;;  %v184_v47 = vmin.f32 %v1311_v40, 0.0  ;;  %436 = vmatpush.msra.mxu0 %v386_v22 }
  0x20   :  { %1027 = vpow2.f32 %v192_v18  ;;  %v187_v54 = vmin.f32 %v1314_v43, 0.0  ;;  %v1323_v58 = vadd.f32 %v1293_v2, %v148_v44  ;;  %v152_v59 = vmul.f32 %v1291_v1, %v139_v55  ;;  %v385_v25 = vld [vmem:[#allocation10 + $0x60] sm:$0xff] }
  0x21   :  { %1029 = vpow2.f32 %v194_v19  ;;  %v200_v53 = vmul.f32 1.442695, %v184_v47  ;;  %v153_v0 = vmul.f32 %v1291_v1, %v140_v60  ;;  %vm174_vm5 = vcmp.gt.f32.partialorder %v1305_v24, 0.0  ;;  %437 = vmatpush.msra.mxu0 %v385_v25  ;;  %v373_v25 = vld [vmem:[#allocation10] sm:$0xff] }
  0x22   :  { %1031 = vpow2.f32 %v196_v20  ;;  %v206_v63 = vmul.f32 1.442695, %v187_v54  ;;  %v185_v4 = vmin.f32 %v1323_v58, 0.0  ;;  %v1331_v5 = vadd.f32 %v1293_v2, %v152_v59  ;;  %v379_v59 = vld [vmem:[#allocation10 + $0x30] sm:$0xff] }
  0x23   :  { %1033 = vpow2.f32 %v198_v21  ;;  %v1336_v8 = vadd.f32 %v1293_v2, %v153_v0  ;;  %v151_v14 = vmul.f32 %v1291_v1, %v138_v9  ;;  %vm172_vm6 = vcmp.gt.f32.partialorder %v1311_v40, 0.0  ;;  %438 = vmatpush.msra.mxu0 %v384_v28  ;;  %v393_v28 = vld [vmem:[#allocation10 + $0xa0] sm:$0xff] }
  0x24   :  { %1035 = vpow2.f32 %v204_v31  ;;  %vm175_vm7 = vcmp.gt.f32.partialorder %v1314_v43, 0.0  ;;  %vm173_vm8 = vcmp.gt.f32.partialorder %v1323_v58, 0.0  ;;  %vm177_vm9 = vcmp.gt.f32.partialorder %v1331_v5, 0.0 }
  0x25   :  { %1037 = vpow2.f32 %v200_v53  ;;  %v1343_v21 = vadd.f32 %v1293_v2, %v151_v14  ;;  %439 = vmatpush.msra.mxu0 %v383_v32  ;;  %vm178_vm10 = vcmp.gt.f32.partialorder %v1336_v8, 0.0  ;;  %v380_v53 = vld [vmem:[#allocation10 + $0x38] sm:$0xff]  ;;  %v389_v32 = vld [vmem:[#allocation10 + $0x80] sm:$0xff] }
  0x26   :  { %v1028_v26 = vpop.eup %1027  ;;  %1039 = vpow2.f32 %v206_v63 }
  0x27   :  { %v1030_v29 = vpop.eup %1029  ;;  %v951_v30 = vadd.f32 -1.0, %v1028_v26  ;;  %vm176_vm11 = vcmp.gt.f32.partialorder %v1343_v21, 0.0 }
  0x28   :  { %v1032_v34 = vpop.eup %1031  ;;  %v952_v35 = vadd.f32 -1.0, %v1030_v29 }
  0x29   :  { %v1034_v37 = vpop.eup %1033  ;;  %v228_v38 = vmul.f32 1.6732632, %v951_v30  ;;  %v953_v39 = vadd.f32 -1.0, %v1032_v34 }
  0x2a   :  { %v229_v41 = vmul.f32 1.6732632, %v952_v35  ;;  %v954_v42 = vadd.f32 -1.0, %v1034_v37  ;;  %v1036_v61 = vpop.eup %1035 }
  0x2b   :  { %v240_v45 = vsel %vm168_vm1, %v156_v10, %v228_v38  ;;  %v230_v46 = vmul.f32 1.6732632, %v953_v39  ;;  %v957_v3 = vadd.f32 -1.0, %v1036_v61  ;;  %v1038_v17 = vpop.eup %1037 }
  0x2c   :  { %v252_v48 = vmul.f32 1.050701, %v240_v45  ;;  %v241_v49 = vsel %vm169_vm2, %v157_v11, %v229_v41  ;;  %v231_v50 = vmul.f32 1.6732632, %v954_v42  ;;  %v202_v11 = vmul.f32 1.442695, %v185_v4  ;;  %v1040_v26 = vpop.eup %1039 }
  0x2d   :  { %v253_v51 = vmul.f32 1.050701, %v241_v49  ;;  %v242_v52 = vsel %vm170_vm3, %v158_v12, %v230_v46  ;;  %v234_v10 = vmul.f32 1.6732632, %v957_v3  ;;  %v189_v12 = vmin.f32 %v1331_v5, 0.0  ;;  %v382_v41 = vld [vmem:[#allocation10 + $0x48] sm:$0xff] }
  0x2e   :  { %265 = vst.msk [vmem:[#allocation2 + $0x1] sm:$0xff] %vm264_vm0, %v252_v48  ;;  %v254_v56 = vmul.f32 1.050701, %v242_v52  ;;  %v243_v57 = vsel %vm171_vm4, %v159_v13, %v231_v50  ;;  %v190_v13 = vmin.f32 %v1336_v8, 0.0  ;;  %1041 = vpow2.f32 %v202_v11  ;;  %440 = vmatpush.msra.mxu0 %v382_v41  ;;  %v378_v3 = vld [vmem:[#allocation10 + $0x28] sm:$0xff] }
  0x2f   :  { %266 = vst.msk [vmem:[#allocation2 + $0x9] sm:$0xff] %vm264_vm0, %v253_v51  ;;  %v255_v62 = vmul.f32 1.050701, %v243_v57  ;;  %v246_v15 = vsel %vm174_vm5, %v1305_v24, %v234_v10  ;;  %v210_v16 = vmul.f32 1.442695, %v189_v12  ;;  %v955_v23 = vadd.f32 -1.0, %v1038_v17 }
  0x30   :  { %267 = vst.msk [vmem:[#allocation2 + $0x19] sm:$0xff] %vm264_vm0, %v254_v56  ;;  %v258_v19 = vmul.f32 1.050701, %v246_v15  ;;  %v212_v20 = vmul.f32 1.442695, %v190_v13  ;;  %v188_v24 = vmin.f32 %v1343_v21, 0.0  ;;  %v154_v42 = vmul.f32 %v1291_v1, %v141_v36 }
  0x31   :  { %268 = vst.msk [vmem:[#allocation2 + $0x21] sm:$0xff] %vm264_vm0, %v255_v62  ;;  %1043 = vpow2.f32 %v210_v16  ;;  %v232_v29 = vmul.f32 1.6732632, %v955_v23  ;;  %v958_v30 = vadd.f32 -1.0, %v1040_v26  ;;  %v376_v10 = vld [vmem:[#allocation10 + $0x18] sm:$0xff]  ;;  %v375_v12 = vld [vmem:[#allocation10 + $0x10] sm:$0xff] }
  0x32   :  { %271 = vst.msk [vmem:[#allocation2 + $0x49] sm:$0xff] %vm264_vm0, %v258_v19  ;;  %1045 = vpow2.f32 %v212_v20  ;;  %v208_v31 = vmul.f32 1.442695, %v188_v24  ;;  %v167_v51 = vadd.f32 %v1293_v2, %v154_v42  ;;  %v374_v16 = vld [vmem:[#allocation10 + $0x8] sm:$0xff]  ;;  %v1235_v23 = vmov 0.0   ;;  %v396_v26 = vld [vmem:[#allocation10 + $0xb8] sm:$0xff] }
  0x33   :  { %v244_v34 = vsel %vm172_vm6, %v1311_v40, %v232_v29  ;;  %v235_v35 = vmul.f32 1.6732632, %v958_v30  ;;  %v381_v40 = vld [vmem:[#allocation10 + $0x40] sm:$0xff]  ;;  %106 = vst.msk [vmem:[#allocation2] sm:$0x1] %vm105_vm13, %v1235_v23  ;;  %987 = vmatpush.msra.mxu1 %v396_v26  ;;  %988 = vmatpush.msra.mxu2 %v396_v26  ;;  %v394_v24 = vld [vmem:[#allocation10 + $0xa8] sm:$0xff] }
  0x34   :  { %v1042_v33 = vpop.eup %1041  ;;  %v256_v38 = vmul.f32 1.050701, %v244_v34  ;;  %1047 = vpow2.f32 %v208_v31  ;;  %v191_v54 = vmin.f32 %v167_v51, 0.0  ;;  %441 = vmatpush.msra.mxu0 %v381_v40  ;;  %vm179_vm12 = vcmp.gt.f32.partialorder %v167_v51, 0.0  ;;  %107 = vst.msk [vmem:[#allocation2 + $0x18] sm:$0x1] %vm105_vm13, %v1235_v23  ;;  %989 = vmatpush.msra.mxu3 %v396_v26 }
  0x35   :  { %v289_v18 = vld [vmem:[#allocation2 + $0x1] sm:$0xff]  ;;  %v956_v39 = vadd.f32 -1.0, %v1042_v33  ;;  %v247_v46 = vsel %vm175_vm7, %v1314_v43, %v235_v35  ;;  %108 = vst.msk [vmem:[#allocation2 + $0x30] sm:$0x1] %vm105_vm13, %v1235_v23  ;;  %v391_v30 = vld [vmem:[#allocation10 + $0x90] sm:$0xff]  ;;  %v390_v31 = vld [vmem:[#allocation10 + $0x88] sm:$0xff] }
  0x36   :  { %325 = vrot.lane.b32.xlu0 %v289_v18, %s1234_s2  ;;  %v290_v37 = vld [vmem:[#allocation2 + $0x9] sm:$0xff]  ;;  %269 = vst.msk [vmem:[#allocation2 + $0x31] sm:$0xff] %vm264_vm0, %v256_v38  ;;  %v259_v48 = vmul.f32 1.050701, %v247_v46  ;;  %v214_v60 = vmul.f32 1.442695, %v191_v54  ;;  %442 = vmatpush.msra.mxu0 %v380_v53 }
  0x37   :  { %v291_v27 = vld [vmem:[#allocation2 + $0x19] sm:$0xff]  ;;  %v1044_v44 = vpop.eup %1043  ;;  %v233_v49 = vmul.f32 1.6732632, %v956_v39  ;;  %109 = vst.msk [vmem:[#allocation2 + $0x48] sm:$0x1] %vm105_vm13, %v1235_v23  ;;  %v278_v39 = vld [vmem:[#allocation2 + $0x8] sm:$0xff] }
  0x38   :  { %329 = vrot.lane.b32.xlu1 %v291_v27, %s1234_s2  ;;  %v292_v45 = vld [vmem:[#allocation2 + $0x21] sm:$0xff]  ;;  %v1046_v47 = vpop.eup %1045  ;;  %v960_v50 = vadd.f32 -1.0, %v1044_v44  ;;  %272 = vst.msk [vmem:[#allocation2 + $0x51] sm:$0xff] %vm264_vm0, %v259_v48  ;;  %1049 = vpow2.f32 %v214_v60  ;;  %443 = vmatpush.msra.mxu0 %v379_v59  ;;  %v395_v27 = vld [vmem:[#allocation10 + $0xb0] sm:$0xff] }
  0x39   :  { %v961_v1 = vadd.f32 -1.0, %v1046_v47  ;;  %v245_v43 = vsel %vm173_vm8, %v1323_v58, %v233_v49  ;;  %v295_v63 = vld [vmem:[#allocation2 + $0x49] sm:$0xff]  ;;  %110 = vst.msk [vmem:[#allocation2 + $0x60] sm:$0x1] %vm105_vm13, %v1235_v23  ;;  %990 = vmatpush.msra.mxu1 %v395_v27  ;;  %991 = vmatpush.msra.mxu2 %v395_v27  ;;  %v392_v29 = vld [vmem:[#allocation10 + $0x98] sm:$0xff] }
  0x3a   :  { %v237_v52 = vmul.f32 1.6732632, %v960_v50  ;;  %v257_v55 = vmul.f32 1.050701, %v245_v43  ;;  %v1048_v2 = vpop.eup %1047  ;;  %444 = vmatpush.msra.mxu0 %v378_v3  ;;  %111 = vst.msk [vmem:[#allocation2 + $0x78] sm:$0x1] %vm105_vm13, %v1235_v23  ;;  %992 = vmatpush.msra.mxu3 %v395_v27 }
  0x3b   :  { %v238_v56 = vmul.f32 1.6732632, %v961_v1  ;;  %v959_v62 = vadd.f32 -1.0, %v1048_v2  ;;  %112 = vst.msk [vmem:[#allocation2 + $0x11] sm:$0x1] %vm105_vm13, %v1235_v23  ;;  %993 = vmatpush.msra.mxu1 %v394_v24  ;;  %994 = vmatpush.msra.mxu2 %v394_v24  ;;  %v303_v33 = vld [vmem:[#allocation2 + $0x1a] sm:$0xff] }
  0x3c   :  { %v249_v57 = vsel %vm177_vm9, %v1331_v5, %v237_v52  ;;  %270 = vst.msk [vmem:[#allocation2 + $0x39] sm:$0xff] %vm264_vm0, %v257_v55  ;;  %v377_v5 = vld [vmem:[#allocation10 + $0x20] sm:$0xff]  ;;  %995 = vmatpush.msra.mxu3 %v394_v24  ;;  %v279_v40 = vld [vmem:[#allocation2 + $0x18] sm:$0xff] }
  0x3d   :  { %v261_v61 = vmul.f32 1.050701, %v249_v57  ;;  %v250_v58 = vsel %vm178_vm10, %v1336_v8, %v238_v56  ;;  %v293_v4 = vld [vmem:[#allocation2 + $0x31] sm:$0xff]  ;;  %v236_v6 = vmul.f32 1.6732632, %v959_v62  ;;  %445 = vmatpush.msra.mxu0 %v377_v5  ;;  %996 = vmatpush.msra.mxu1 %v393_v28  ;;  %v277_v35 = vld [vmem:[#allocation2] sm:$0xff] }
  0x3e   :  { %327 = vrot.lane.b32.xlu0 %v290_v37, %s1234_s2  ;;  %v262_v0 = vmul.f32 1.050701, %v250_v58  ;;  %333 = vrot.lane.b32.xlu2 %v293_v4, %s1234_s2  ;;  %v1050_v11 = vpop.eup %1049  ;;  %113 = vst.msk [vmem:[#allocation2 + $0x29] sm:$0x1] %vm105_vm13, %v1235_v23  ;;  %v280_v50 = vld [vmem:[#allocation2 + $0x20] sm:$0xff]  ;;  %v281_v52 = vld [vmem:[#allocation2 + $0x30] sm:$0xff] }
  0x3f   :  { %274 = vst.msk [vmem:[#allocation2 + $0x69] sm:$0xff] %vm264_vm0, %v261_v61  ;;  %v296_v7 = vld [vmem:[#allocation2 + $0x51] sm:$0xff]  ;;  %v248_v8 = vsel %vm176_vm11, %v1343_v21, %v236_v6  ;;  %446 = vmatpush.msra.mxu0 %v376_v10  ;;  %v962_v14 = vadd.f32 -1.0, %v1050_v11  ;;  %997 = vmatpush.msra.mxu2 %v393_v28  ;;  %v283_v60 = vld [vmem:[#allocation2 + $0x48] sm:$0xff] }
  0x40   :  { %331 = vrot.lane.b32.xlu1 %v292_v45, %s1234_s2  ;;  %275 = vst.msk [vmem:[#allocation2 + $0x79] sm:$0xff] %vm264_vm0, %v262_v0  ;;  %v260_v9 = vmul.f32 1.050701, %v248_v8  ;;  %998 = vmatpush.msra.mxu3 %v393_v28  ;;  %v307_v46 = vld [vmem:[#allocation2 + $0x4a] sm:$0xff] }
  0x41   :  { %447 = vmatpush.msra.mxu0 %v375_v12  ;;  %v239_v17 = vmul.f32 1.6732632, %v962_v14  ;;  %114 = vst.msk [vmem:[#allocation2 + $0x41] sm:$0x1] %vm105_vm13, %v1235_v23  ;;  %999 = vmatpush.msra.mxu1 %v392_v29 }
  0x42   :  { %273 = vst.msk [vmem:[#allocation2 + $0x61] sm:$0xff] %vm264_vm0, %v260_v9  ;;  %1000 = vmatpush.msra.mxu2 %v392_v29  ;;  %1001 = vmatpush.msra.mxu3 %v392_v29 }
  0x43   :  { %v294_v13 = vld [vmem:[#allocation2 + $0x39] sm:$0xff]  ;;  %v251_v19 = vsel %vm179_vm12, %v167_v51, %v239_v17  ;;  %448 = vmatpush.msra.mxu0 %v374_v16  ;;  %115 = vst.msk [vmem:[#allocation2 + $0x59] sm:$0x1] %vm105_vm13, %v1235_v23  ;;  %1002 = vmatpush.msra.mxu1 %v391_v30  ;;  %v302_v16 = vld [vmem:[#allocation2 + $0xa] sm:$0xff] }
  0x44   :  { %v263_v20 = vmul.f32 1.050701, %v251_v19  ;;  %116 = vst.msk [vmem:[#allocation2 + $0x71] sm:$0x1] %vm105_vm13, %v1235_v23  ;;  %1003 = vmatpush.msra.mxu2 %v391_v30  ;;  %1004 = vmatpush.msra.mxu3 %v391_v30  ;;  %v305_v38 = vld [vmem:[#allocation2 + $0x32] sm:$0xff] }
  0x45   :  { %449 = vmatpush.msra.mxu0 %v373_v25  ;;  %117 = vst.msk [vmem:[#allocation2 + $0x89] sm:$0x1] %vm105_vm13, %v1235_v23  ;;  %1005 = vmatpush.msra.mxu1 %v390_v31  ;;  %v304_v34 = vld [vmem:[#allocation2 + $0x22] sm:$0xff]  ;;  %v282_v56 = vld [vmem:[#allocation2 + $0x38] sm:$0xff] }
  0x46   :  { %337 = vrot.lane.b32.xlu0 %v295_v63, %s1234_s2  ;;  %v298_v15 = vld [vmem:[#allocation2 + $0x69] sm:$0xff]  ;;  %335 = vrot.lane.b32.xlu2 %v294_v13, %s1234_s2  ;;  %276 = vst.msk [vmem:[#allocation2 + $0x81] sm:$0xff] %vm264_vm0, %v263_v20  ;;  %v1422_v20 = vld [vmem:[#allocation9] ss:$0 sm:$0xff] }
  0x47   :  { %v299_v18 = vld [vmem:[#allocation2 + $0x79] sm:$0xff]  ;;  %495 = vmatpush.msrb.mxu0 %v396_v26  ;;  %118 = vst [vmem:[#allocation3] sm:$0x1] %v1235_v23  ;;  %1006 = vmatpush.msra.mxu2 %v390_v31  ;;  %v284_v63 = vld [vmem:[#allocation2 + $0x50] sm:$0xff]  ;;  %v1427_v26 = vld [vmem:[#allocation9 + $0x2] ss:$0 sm:$0xff] }
  0x48   :  { %339 = vrot.lane.b32.xlu1 %v296_v7, %s1234_s2  ;;  %119 = vst [vmem:[#allocation3 + $0x18] sm:$0x1] %v1235_v23  ;;  %1007 = vmatpush.msra.mxu3 %v390_v31  ;;  %v306_v45 = vld [vmem:[#allocation2 + $0x3a] sm:$0xff] }
  0x49   :  { %v297_v21 = vld [vmem:[#allocation2 + $0x61] sm:$0xff]  ;;  %496 = vmatpush.msrb.mxu0 %v395_v27  ;;  %120 = vst [vmem:[#allocation3 + $0x30] sm:$0x1] %v1235_v23  ;;  %1008 = vmatpush.msra.mxu1 %v389_v32  ;;  %v287_v10 = vld [vmem:[#allocation2 + $0x78] sm:$0xff] }
  0x4a   :  { %121 = vst [vmem:[#allocation3 + $0x48] sm:$0x1] %v1235_v23  ;;  %965 = vmatmul.msk.f32.vlgmr.msra.gmra.mxu1 %vm264_vm0, %v303_v33  ;;  %1009 = vmatpush.msra.mxu2 %v389_v32  ;;  %v308_v48 = vld [vmem:[#allocation2 + $0x52] sm:$0xff]  ;;  %v309_v43 = vld [vmem:[#allocation2 + $0x62] sm:$0xff] }
  0x4b   :  { %122 = vst [vmem:[#allocation3 + $0x60] sm:$0x1] %v1235_v23  ;;  %497 = vmatpush.msrb.mxu0 %v394_v24  ;;  %1010 = vmatpush.msra.mxu3 %v389_v32  ;;  %v310_v54 = vld [vmem:[#allocation2 + $0x6a] sm:$0xff]  ;;  %v285_v4 = vld [vmem:[#allocation2 + $0x60] sm:$0xff] }
  0x4c   :  { %123 = vst [vmem:[#allocation3 + $0x78] sm:$0x1] %v1235_v23  ;;  %969 = vmatmul.msk.f32.vlgmr.msra.gmra.mxu2 %vm264_vm0, %v307_v46  ;;  %v286_v7 = vld [vmem:[#allocation2 + $0x68] sm:$0xff] }
  0x4d   :  { %v300_v22 = vld [vmem:[#allocation2 + $0x81] sm:$0xff]  ;;  %124 = vst [vmem:[#allocation3 + $0x11] sm:$0x1] %v1235_v23  ;;  %498 = vmatpush.msrb.mxu0 %v393_v28 }
  0x4e   :  { %343 = vrot.lane.b32.xlu0 %v298_v15, %s1234_s2  ;;  %341 = vrot.lane.b32.xlu2 %v297_v21, %s1234_s2  ;;  %125 = vst [vmem:[#allocation3 + $0x29] sm:$0x1] %v1235_v23  ;;  %v311_v57 = vld [vmem:[#allocation2 + $0x7a] sm:$0xff]  ;;  %v312_v58 = vld [vmem:[#allocation2 + $0x82] sm:$0xff] }
  0x4f   :  { %126 = vst [vmem:[#allocation3 + $0x41] sm:$0x1] %v1235_v23  ;;  %499 = vmatpush.msrb.mxu0 %v392_v29  ;;  %974 = vmatmul.msk.f32.vlgmr.msra.gmra.mxu3 %vm264_vm0, %v312_v58  ;;  %v288_v13 = vld [vmem:[#allocation2 + $0x80] sm:$0xff] }
  0x50   :  { %345 = vrot.lane.b32.xlu1 %v299_v18, %s1234_s2  ;;  %127 = vst [vmem:[#allocation3 + $0x59] sm:$0x1] %v1235_v23  ;;  %v301_v15 = vld [vmem:[#allocation2 + $0x2] sm:$0xff] }
  0x51   :  { %128 = vst [vmem:[#allocation3 + $0x71] sm:$0x1] %v1235_v23  ;;  %500 = vmatpush.msrb.mxu0 %v391_v30 }
  0x52   :  { %129 = vst [vmem:[#allocation3 + $0x89] sm:$0x1] %v1235_v23  ;;  %966 = vmatmul.msk.f32.gmra.mxu1 %vm264_vm0, %v304_v34  ;;  %v1425_v23 = vld [vmem:[#allocation9 + $0x1] ss:$0 sm:$0xff] }
  0x53   :  { %501 = vmatpush.msrb.mxu0 %v390_v31 }
  0x54   :  { %970 = vmatmul.msk.f32.gmra.mxu2 %vm264_vm0, %v308_v48 }
  0x55   :  { %502 = vmatpush.msrb.mxu0 %v389_v32 }
  0x56   :  { %347 = vrot.lane.b32.xlu2 %v300_v22, %s1234_s2 }
  0x5a   :  { %967 = vmatmul.msk.f32.gmra.mxu1 %vm264_vm0, %v305_v38 }
  0x5c   :  { %971 = vmatmul.msk.f32.gmra.mxu2 %vm264_vm0, %v309_v43 }
  0x62   :  { %968 = vmatmul.msk.f32.gmra.mxu1 %vm264_vm0, %v306_v45 }
  0x64   :  { %972 = vmatmul.msk.f32.gmra.mxu2 %vm264_vm0, %v310_v54 }
  0x6c   :  { %973 = vmatmul.msk.f32.gmra.mxu2 %vm264_vm0, %v311_v57 }
  0x98   :  { %v334_v1 = vpop.permute.xlu2 %333 }
  0x99   :  { %v365_v53 = vsel %vm264_vm0, %v281_v52, %v334_v1 }
  0xa0   :  { %v336_v55 = vpop.permute.xlu2 %335 }
  0xa1   :  { %v366_v2 = vsel %vm264_vm0, %v282_v56, %v336_v55 }
  0xa8   :  { %v326_v36 = vpop.permute.xlu0 %325  ;;  %v342_v3 = vpop.permute.xlu2 %341 }
  0xa9   :  { %v361_v37 = vsel %vm264_vm0, %v277_v35, %v326_v36  ;;  %v369_v6 = vsel %vm264_vm0, %v285_v4, %v342_v3 }
  0xaa   :  { %450 = vmatmul.f32.vlgmr.msra.gmra.mxu0 %v361_v37  ;;  %v330_v44 = vpop.permute.xlu1 %329 }
  0xab   :  { %v363_v47 = vsel %vm264_vm0, %v279_v40, %v330_v44 }
  0xb0   :  { %v328_v41 = vpop.permute.xlu0 %327  ;;  %v348_v12 = vpop.permute.xlu2 %347 }
  0xb1   :  { %v362_v42 = vsel %vm264_vm0, %v278_v39, %v328_v41  ;;  %v372_v14 = vsel %vm264_vm0, %v288_v13, %v348_v12 }
  0xb2   :  { %453 = vmatmul.f32.gmra.mxu0 %v362_v42  ;;  %v332_v49 = vpop.permute.xlu1 %331 }
  0xb3   :  { %v364_v51 = vsel %vm264_vm0, %v280_v50, %v332_v49 }
  0xb8   :  { %v338_v59 = vpop.permute.xlu0 %337 }
  0xb9   :  { %v367_v61 = vsel %vm264_vm0, %v283_v60, %v338_v59 }
  0xba   :  { %456 = vmatmul.f32.gmra.mxu0 %v363_v47  ;;  %v340_v62 = vpop.permute.xlu1 %339 }
  0xbb   :  { %v368_v0 = vsel %vm264_vm0, %v284_v63, %v340_v62 }
  0xc0   :  { %v344_v5 = vpop.permute.xlu0 %343 }
  0xc1   :  { %v370_v8 = vsel %vm264_vm0, %v286_v7, %v344_v5 }
  0xc2   :  { %459 = vmatmul.f32.gmra.mxu0 %v364_v51  ;;  %v346_v9 = vpop.permute.xlu1 %345 }
  0xc3   :  { %v371_v11 = vsel %vm264_vm0, %v287_v10, %v346_v9 }
  0xc7   :  { %v510_v19 = vpop.f32.mrf.mxu1 }
  0xca   :  { %462 = vmatmul.f32.gmra.mxu0 %v365_v53 }
  0xcf   :  { %v513_v27 = vpop.f32.mrf.mxu1  ;;  %v522_v51 = vpop.f32.mrf.mxu2 }
  0xd2   :  { %465 = vmatmul.f32.gmra.mxu0 %v366_v2 }
  0xd7   :  { %v516_v35 = vpop.f32.mrf.mxu1 }
  0xda   :  { %468 = vmatmul.f32.gmra.mxu0 %v367_v61 }
  0xdf   :  { %v519_v48 = vpop.f32.mrf.mxu1 }
  0xe2   :  { %471 = vmatmul.f32.gmra.mxu0 %v368_v0  ;;  %v525_v0 = vpop.f32.mrf.mxu2 }
  0xea   :  { %474 = vmatmul.f32.gmra.mxu0 %v369_v6 }
  0xf2   :  { %477 = vmatmul.f32.gmra.mxu0 %v370_v8 }
  0xfa   :  { %480 = vmatmul.f32.gmra.mxu0 %v371_v11 }
 0x102   :  { %483 = vmatmul.f32.gmra.mxu0 %v372_v14 }
 0x10a   :  { %963 = vmatmul.msk.f32.vlgmr.msrb.gmra.mxu0 %vm264_vm0, %v301_v15  ;;  %v741_v15 = vld [vmem:[#allocation12 + $0xf8] sm:$0xff] }
 0x10b   :  { %812 = vmatpush.msrb.mxu3 %v741_v15  ;;  %v730_v15 = vld [vmem:[#allocation12 + $0xa0] sm:$0xff] }
 0x112   :  { %964 = vmatmul.msk.f32.gmra.mxu0 %vm264_vm0, %v302_v16 }
 0x127   :  { %v1418_v17 = vpop.f32.mrf.mxu0 }
 0x12f   :  { %v1420_v18 = vpop.f32.mrf.mxu0 }
 0x137   :  { %v457_v21 = vpop.f32.mrf.mxu0 }
 0x138   :  { %v458_v22 = vadd.f32 %v1422_v20, %v457_v21 }
 0x13a   :  { %v511_v25 = vadd.f32 %v510_v19, %v458_v22  ;;  %v740_v22 = vld [vmem:[#allocation12 + $0xf0] sm:$0xff] }
 0x13b   :  { %813 = vmatpush.msrb.mxu3 %v740_v22 }
 0x13c   :  { %v543_v24 = vmul.f32 %v1425_v23, %v511_v25 }
 0x13e   :  { %v556_v28 = vadd.f32 %v1427_v26, %v543_v24 }
 0x13f   :  { %v460_v29 = vpop.f32.mrf.mxu0 }
 0x140   :  { %v580_v30 = vmin.f32 %v556_v28, 0.0  ;;  %v461_v31 = vadd.f32 %v1422_v20, %v460_v29  ;;  %vm568_vm14 = vcmp.gt.f32.partialorder %v556_v28, 0.0 }
 0x142   :  { %v594_v32 = vmul.f32 1.442695, %v580_v30  ;;  %v514_v33 = vadd.f32 %v513_v27, %v461_v31  ;;  %v528_v27 = vpop.f32.mrf.mxu2  ;;  %v738_v31 = vld [vmem:[#allocation12 + $0xe0] sm:$0xff] }
 0x144   :  { %1051 = vpow2.f32 %v594_v32  ;;  %v544_v34 = vmul.f32 %v1425_v23, %v514_v33 }
 0x146   :  { %v557_v36 = vadd.f32 %v1427_v26, %v544_v34 }
 0x147   :  { %v463_v37 = vpop.f32.mrf.mxu0 }
 0x148   :  { %v581_v38 = vmin.f32 %v557_v36, 0.0  ;;  %v464_v39 = vadd.f32 %v1422_v20, %v463_v37  ;;  %vm569_vm15 = vcmp.gt.f32.partialorder %v557_v36, 0.0  ;;  %v725_v37 = vld [vmem:[#allocation12 + $0x78] sm:$0xff] }
 0x149   :  { %759 = vmatpush.msrb.mxu2 %v725_v37 }
 0x14a   :  { %v1052_v41 = vpop.eup %1051  ;;  %v596_v42 = vmul.f32 1.442695, %v581_v38  ;;  %v517_v44 = vadd.f32 %v516_v35, %v464_v39  ;;  %v737_v38 = vld [vmem:[#allocation12 + $0xd8] sm:$0xff] }
 0x14b   :  { %v977_v45 = vadd.f32 -1.0, %v1052_v41 }
 0x14c   :  { %1053 = vpow2.f32 %v596_v42  ;;  %v545_v46 = vmul.f32 %v1425_v23, %v517_v44  ;;  %v724_v44 = vld [vmem:[#allocation12 + $0x70] sm:$0xff] }
 0x14d   :  { %v628_v40 = vmul.f32 1.6732632, %v977_v45  ;;  %v736_v45 = vld [vmem:[#allocation12 + $0xd0] sm:$0xff]  ;;  %760 = vmatpush.msrb.mxu2 %v724_v44 }
 0x14e   :  { %v558_v47 = vadd.f32 %v1427_v26, %v545_v46 }
 0x14f   :  { %v640_v49 = vsel %vm568_vm14, %v556_v28, %v628_v40  ;;  %v466_v50 = vpop.f32.mrf.mxu0  ;;  %v739_v28 = vld [vmem:[#allocation12 + $0xe8] sm:$0xff] }
 0x150   :  { %v1437_v1 = vmul.f32 1.050701, %v640_v49  ;;  %v582_v43 = vmin.f32 %v558_v47, 0.0  ;;  %v467_v52 = vadd.f32 %v1422_v20, %v466_v50  ;;  %vm570_vm0 = vcmp.gt.f32.partialorder %v558_v47, 0.0  ;;  %814 = vmatpush.msrb.mxu3 %v739_v28  ;;  %v531_v50 = vpop.f32.mrf.mxu2  ;;  %v753_v28 = vld [vmem:[#allocation12 + $0x158] sm:$0xff] }
 0x152   :  { %v1054_v53 = vpop.eup %1053  ;;  %664 = vst [vmem:[#allocation3 + $0x19] sm:$0xff] %v1437_v1  ;;  %v598_v54 = vmul.f32 1.442695, %v582_v43  ;;  %v520_v55 = vadd.f32 %v519_v48, %v467_v52  ;;  %815 = vmatpush.msrb.mxu3 %v738_v31  ;;  %v735_v48 = vld [vmem:[#allocation12 + $0xc8] sm:$0xff]  ;;  %v722_v43 = vld [vmem:[#allocation12 + $0x60] sm:$0xff] }
 0x153   :  { %v978_v56 = vadd.f32 -1.0, %v1054_v53  ;;  %v734_v52 = vld [vmem:[#allocation12 + $0xc0] sm:$0xff] }
 0x154   :  { %1055 = vpow2.f32 %v598_v54  ;;  %v546_v2 = vmul.f32 %v1425_v23, %v520_v55  ;;  %816 = vmatpush.msrb.mxu3 %v737_v38 }
 0x155   :  { %v629_v57 = vmul.f32 1.6732632, %v978_v56 }
 0x156   :  { %v559_v59 = vadd.f32 %v1427_v26, %v546_v2  ;;  %817 = vmatpush.msrb.mxu3 %v736_v45 }
 0x157   :  { %v641_v60 = vsel %vm569_vm15, %v557_v36, %v629_v57  ;;  %v469_v61 = vpop.f32.mrf.mxu0  ;;  %v721_v57 = vld [vmem:[#allocation12 + $0x58] sm:$0xff] }
 0x158   :  { %v1443_v58 = vmul.f32 1.050701, %v641_v60  ;;  %v583_v62 = vmin.f32 %v559_v59, 0.0  ;;  %v470_v63 = vadd.f32 %v1422_v20, %v469_v61  ;;  %vm571_vm1 = vcmp.gt.f32.partialorder %v559_v59, 0.0  ;;  %818 = vmatpush.msrb.mxu3 %v735_v48  ;;  %v733_v60 = vld [vmem:[#allocation12 + $0xb8] sm:$0xff] }
 0x15a   :  { %v1056_v3 = vpop.eup %1055  ;;  %665 = vst [vmem:[#allocation3 + $0x21] sm:$0xff] %v1443_v58  ;;  %v600_v4 = vmul.f32 1.442695, %v583_v62  ;;  %v523_v6 = vadd.f32 %v522_v51, %v470_v63  ;;  %819 = vmatpush.msrb.mxu3 %v734_v52 }
 0x15b   :  { %v979_v5 = vadd.f32 -1.0, %v1056_v3  ;;  %v756_v3 = vld [vmem:[#allocation12 + $0x170] sm:$0xff] }
 0x15c   :  { %1057 = vpow2.f32 %v600_v4  ;;  %v547_v7 = vmul.f32 %v1425_v23, %v523_v6  ;;  %820 = vmatpush.msrb.mxu3 %v733_v60  ;;  %v732_v4 = vld [vmem:[#allocation12 + $0xb0] sm:$0xff] }
 0x15d   :  { %v630_v8 = vmul.f32 1.6732632, %v979_v5  ;;  %v748_v60 = vld [vmem:[#allocation12 + $0x130] sm:$0xff] }
 0x15e   :  { %v560_v9 = vadd.f32 %v1427_v26, %v547_v7  ;;  %v719_v7 = vld [vmem:[#allocation12 + $0x48] sm:$0xff]  ;;  %821 = vmatpush.msrb.mxu3 %v732_v4  ;;  %v452_v4 = vadd.f32 %v1422_v20, %v1418_v17 }
 0x15f   :  { %v642_v10 = vsel %vm570_vm0, %v558_v47, %v630_v8  ;;  %v472_v11 = vpop.f32.mrf.mxu0  ;;  %v723_v47 = vld [vmem:[#allocation12 + $0x68] sm:$0xff] }
 0x160   :  { %v1449_v12 = vmul.f32 1.050701, %v642_v10  ;;  %v584_v13 = vmin.f32 %v560_v9, 0.0  ;;  %v473_v14 = vadd.f32 %v1422_v20, %v472_v11  ;;  %761 = vmatpush.msrb.mxu2 %v723_v47  ;;  %vm572_vm2 = vcmp.gt.f32.partialorder %v560_v9, 0.0  ;;  %v755_v8 = vld [vmem:[#allocation12 + $0x168] sm:$0xff]  ;;  %v726_v47 = vld [vmem:[#allocation12 + $0x80] sm:$0xff] }
 0x162   :  { %v1058_v16 = vpop.eup %1057  ;;  %666 = vst [vmem:[#allocation3 + $0x31] sm:$0xff] %v1449_v12  ;;  %v602_v19 = vmul.f32 1.442695, %v584_v13  ;;  %v526_v21 = vadd.f32 %v525_v0, %v473_v14  ;;  %762 = vmatpush.msrb.mxu2 %v722_v43  ;;  %v720_v0 = vld [vmem:[#allocation12 + $0x50] sm:$0xff]  ;;  %v718_v13 = vld [vmem:[#allocation12 + $0x40] sm:$0xff] }
 0x163   :  { %v980_v25 = vadd.f32 -1.0, %v1058_v16  ;;  %v754_v14 = vld [vmem:[#allocation12 + $0x160] sm:$0xff] }
 0x164   :  { %1059 = vpow2.f32 %v602_v19  ;;  %v548_v24 = vmul.f32 %v1425_v23, %v526_v21  ;;  %763 = vmatpush.msrb.mxu2 %v721_v57  ;;  %v534_v21 = vpop.f32.mrf.mxu2 }
 0x165   :  { %v631_v29 = vmul.f32 1.6732632, %v980_v25 }
 0x166   :  { %v1455_v30 = vadd.f32 %v1427_v26, %v548_v24  ;;  %764 = vmatpush.msrb.mxu2 %v720_v0  ;;  %v717_v24 = vld [vmem:[#allocation12 + $0x38] sm:$0xff]  ;;  %v747_v0 = vld [vmem:[#allocation12 + $0x128] sm:$0xff] }
 0x167   :  { %v643_v32 = vsel %vm571_vm1, %v559_v59, %v631_v29  ;;  %v475_v33 = vpop.f32.mrf.mxu0  ;;  %v757_v59 = vld [vmem:[#allocation12 + $0x178] sm:$0xff] }
 0x168   :  { %v1457_v34 = vmul.f32 1.050701, %v643_v32  ;;  %v585_v35 = vmin.f32 %v1455_v30, 0.0  ;;  %v476_v36 = vadd.f32 %v1422_v20, %v475_v33  ;;  %865 = vmatpush.msrb.mxu1 %v757_v59  ;;  %765 = vmatpush.msrb.mxu2 %v719_v7  ;;  %vm573_vm3 = vcmp.gt.f32.partialorder %v1455_v30, 0.0  ;;  %v729_v29 = vld [vmem:[#allocation12 + $0x98] sm:$0xff]  ;;  %v716_v33 = vld [vmem:[#allocation12 + $0x30] sm:$0xff] }
 0x169   :  { %v712_v59 = vld [vmem:[#allocation12 + $0x10] sm:$0xff]  ;;  %v746_v7 = vld [vmem:[#allocation12 + $0x120] sm:$0xff] }
 0x16a   :  { %v1060_v39 = vpop.eup %1059  ;;  %667 = vst [vmem:[#allocation3 + $0x39] sm:$0xff] %v1457_v34  ;;  %v604_v41 = vmul.f32 1.442695, %v585_v35  ;;  %v529_v42 = vadd.f32 %v528_v27, %v476_v36  ;;  %866 = vmatpush.msrb.mxu1 %v756_v3  ;;  %766 = vmatpush.msrb.mxu2 %v718_v13  ;;  %v752_v35 = vld [vmem:[#allocation12 + $0x150] sm:$0xff] }
 0x16b   :  { %v981_v46 = vadd.f32 -1.0, %v1060_v39  ;;  %v728_v36 = vld [vmem:[#allocation12 + $0x90] sm:$0xff]  ;;  %v715_v39 = vld [vmem:[#allocation12 + $0x28] sm:$0xff] }
 0x16c   :  { %1061 = vpow2.f32 %v604_v41  ;;  %v549_v40 = vmul.f32 %v1425_v23, %v529_v42  ;;  %867 = vmatpush.msrb.mxu1 %v755_v8  ;;  %767 = vmatpush.msrb.mxu2 %v717_v24  ;;  %v751_v41 = vld [vmem:[#allocation12 + $0x148] sm:$0xff]  ;;  %v742_v24 = vld [vmem:[#allocation12 + $0x100] sm:$0xff] }
 0x16d   :  { %v632_v49 = vmul.f32 1.6732632, %v981_v46  ;;  %v727_v42 = vld [vmem:[#allocation12 + $0x88] sm:$0xff]  ;;  %v714_v46 = vld [vmem:[#allocation12 + $0x20] sm:$0xff] }
 0x16e   :  { %v1464_v51 = vadd.f32 %v1427_v26, %v549_v40  ;;  %868 = vmatpush.msrb.mxu1 %v754_v14  ;;  %768 = vmatpush.msrb.mxu2 %v716_v33  ;;  %v750_v40 = vld [vmem:[#allocation12 + $0x140] sm:$0xff] }
 0x16f   :  { %v644_v53 = vsel %vm572_vm2, %v560_v9, %v632_v49  ;;  %v478_v54 = vpop.f32.mrf.mxu0  ;;  %v731_v9 = vld [vmem:[#allocation12 + $0xa8] sm:$0xff] }
 0x170   :  { %v1466_v55 = vmul.f32 1.050701, %v644_v53  ;;  %v586_v56 = vmin.f32 %v1464_v51, 0.0  ;;  %v479_v2 = vadd.f32 %v1422_v20, %v478_v54  ;;  %822 = vmatpush.msrb.mxu3 %v731_v9  ;;  %869 = vmatpush.msrb.mxu1 %v753_v28  ;;  %vm574_vm4 = vcmp.gt.f32.partialorder %v1464_v51, 0.0  ;;  %v713_v54 = vld [vmem:[#allocation12 + $0x18] sm:$0xff] }
 0x171   :  { %769 = vmatpush.msrb.mxu2 %v715_v39 }
 0x172   :  { %v1062_v61 = vpop.eup %1061  ;;  %668 = vst [vmem:[#allocation3 + $0x49] sm:$0xff] %v1466_v55  ;;  %v606_v62 = vmul.f32 1.442695, %v586_v56  ;;  %v532_v63 = vadd.f32 %v531_v50, %v479_v2  ;;  %823 = vmatpush.msrb.mxu3 %v730_v15  ;;  %870 = vmatpush.msrb.mxu1 %v752_v35  ;;  %v537_v50 = vpop.f32.mrf.mxu3  ;;  %v749_v56 = vld [vmem:[#allocation12 + $0x138] sm:$0xff] }
 0x173   :  { %v982_v6 = vadd.f32 -1.0, %v1062_v61  ;;  %770 = vmatpush.msrb.mxu2 %v714_v46  ;;  %v745_v15 = vld [vmem:[#allocation12 + $0x118] sm:$0xff] }
 0x174   :  { %1063 = vpow2.f32 %v606_v62  ;;  %v550_v5 = vmul.f32 %v1425_v23, %v532_v63  ;;  %824 = vmatpush.msrb.mxu3 %v729_v29  ;;  %871 = vmatpush.msrb.mxu1 %v751_v41  ;;  %v711_v63 = vld [vmem:[#allocation12 + $0x8] sm:$0xff]  ;;  %v455_v29 = vadd.f32 %v1422_v20, %v1420_v18 }
 0x175   :  { %v633_v10 = vmul.f32 1.6732632, %v982_v6  ;;  %771 = vmatpush.msrb.mxu2 %v713_v54 }
 0x176   :  { %v1474_v11 = vadd.f32 %v1427_v26, %v550_v5  ;;  %825 = vmatpush.msrb.mxu3 %v728_v36  ;;  %872 = vmatpush.msrb.mxu1 %v750_v40  ;;  %v710_v5 = vld [vmem:[#allocation12] sm:$0xff] }
 0x177   :  { %v645_v16 = vsel %vm573_vm3, %v1455_v30, %v633_v10  ;;  %v481_v19 = vpop.f32.mrf.mxu0  ;;  %772 = vmatpush.msrb.mxu2 %v712_v59  ;;  %v677_v59 = vld [vmem:[#allocation3 + $0x20] sm:$0xff] }
 0x178   :  { %v1477_v22 = vmul.f32 1.050701, %v645_v16  ;;  %v587_v25 = vmin.f32 %v1474_v11, 0.0  ;;  %v482_v27 = vadd.f32 %v1422_v20, %v481_v19  ;;  %826 = vmatpush.msrb.mxu3 %v727_v42  ;;  %873 = vmatpush.msrb.mxu1 %v749_v56  ;;  %vm575_vm5 = vcmp.gt.f32.partialorder %v1474_v11, 0.0  ;;  %v744_v16 = vld [vmem:[#allocation12 + $0x110] sm:$0xff] }
 0x179   :  { %773 = vmatpush.msrb.mxu2 %v711_v63  ;;  %v679_v63 = vld [vmem:[#allocation3 + $0x38] sm:$0xff] }
 0x17a   :  { %v1064_v31 = vpop.eup %1063  ;;  %669 = vst [vmem:[#allocation3 + $0x51] sm:$0xff] %v1477_v22  ;;  %v608_v30 = vmul.f32 1.442695, %v587_v25  ;;  %v535_v32 = vadd.f32 %v534_v21, %v482_v27  ;;  %827 = vmatpush.msrb.mxu3 %v726_v47  ;;  %874 = vmatpush.msrb.mxu1 %v748_v60  ;;  %v743_v25 = vld [vmem:[#allocation12 + $0x108] sm:$0xff] }
 0x17b   :  { %v983_v37 = vadd.f32 -1.0, %v1064_v31  ;;  %774 = vmatpush.msrb.mxu2 %v710_v5  ;;  %v700_v60 = vld [vmem:[#allocation3 + $0x1a] sm:$0xff] }
 0x17c   :  { %1065 = vpow2.f32 %v608_v30  ;;  %v551_v38 = vmul.f32 %v1425_v23, %v535_v32  ;;  %875 = vmatpush.msrb.mxu1 %v747_v0  ;;  %v680_v0 = vld [vmem:[#allocation3 + $0x48] sm:$0xff] }
 0x17d   :  { %v634_v44 = vmul.f32 1.6732632, %v983_v37 }
 0x17e   :  { %v1485_v45 = vadd.f32 %v1427_v26, %v551_v38  ;;  %876 = vmatpush.msrb.mxu1 %v746_v7 }
 0x17f   :  { %v646_v48 = vsel %vm574_vm4, %v1464_v51, %v634_v44  ;;  %v484_v49 = vpop.f32.mrf.mxu0 }
 0x180   :  { %v1488_v43 = vmul.f32 1.050701, %v646_v48  ;;  %v588_v52 = vmin.f32 %v1485_v45, 0.0  ;;  %v485_v53 = vadd.f32 %v1422_v20, %v484_v49  ;;  %877 = vmatpush.msrb.mxu1 %v745_v15  ;;  %vm576_vm6 = vcmp.gt.f32.partialorder %v1485_v45, 0.0 }
 0x182   :  { %v1066_v2 = vpop.eup %1065  ;;  %670 = vst [vmem:[#allocation3 + $0x61] sm:$0xff] %v1488_v43  ;;  %v610_v57 = vmul.f32 1.442695, %v588_v52  ;;  %v538_v51 = vadd.f32 %v537_v50, %v485_v53  ;;  %878 = vmatpush.msrb.mxu1 %v744_v16 }
 0x183   :  { %v984_v61 = vadd.f32 -1.0, %v1066_v2 }
 0x184   :  { %1067 = vpow2.f32 %v610_v57  ;;  %v552_v62 = vmul.f32 %v1425_v23, %v538_v51  ;;  %879 = vmatpush.msrb.mxu1 %v743_v25  ;;  %v676_v57 = vld [vmem:[#allocation3 + $0x18] sm:$0xff] }
 0x185   :  { %v635_v3 = vmul.f32 1.6732632, %v984_v61  ;;  %v678_v61 = vld [vmem:[#allocation3 + $0x30] sm:$0xff] }
 0x186   :  { %v565_v6 = vadd.f32 %v1427_v26, %v552_v62  ;;  %880 = vmatpush.msrb.mxu1 %v742_v24  ;;  %v701_v62 = vld [vmem:[#allocation3 + $0x22] sm:$0xff] }
 0x187   :  { %v647_v8 = vsel %vm575_vm5, %v1474_v11, %v635_v3  ;;  %v504_v9 = vpop.f32.mrf.mxu0  ;;  %v681_v3 = vld [vmem:[#allocation3 + $0x50] sm:$0xff] }
 0x188   :  { %v1499_v10 = vmul.f32 1.050701, %v647_v8  ;;  %v589_v13 = vmin.f32 %v565_v6, 0.0  ;;  %v505_v14 = vadd.f32 %v504_v9, %v452_v4  ;;  %vm577_vm7 = vcmp.gt.f32.partialorder %v565_v6, 0.0 }
 0x189   :  { %v682_v4 = vld [vmem:[#allocation3 + $0x60] sm:$0xff] }
 0x18a   :  { %v1068_v19 = vpop.eup %1067  ;;  %671 = vst [vmem:[#allocation3 + $0x69] sm:$0xff] %v1499_v10  ;;  %v612_v17 = vmul.f32 1.442695, %v589_v13  ;;  %v541_v21 = vmul.f32 %v1425_v23, %v505_v14 }
 0x18b   :  { %v985_v27 = vadd.f32 -1.0, %v1068_v19 }
 0x18c   :  { %1069 = vpow2.f32 %v612_v17  ;;  %v554_v11 = vadd.f32 %v1427_v26, %v541_v21 }
 0x18d   :  { %v636_v28 = vmul.f32 1.6732632, %v985_v27 }
 0x18e   :  { %v578_v31 = vmin.f32 %v554_v11, 0.0  ;;  %vm566_vm8 = vcmp.gt.f32.partialorder %v554_v11, 0.0 }
 0x18f   :  { %v648_v30 = vsel %vm576_vm6, %v1485_v45, %v636_v28  ;;  %v507_v32 = vpop.f32.mrf.mxu0 }
 0x190   :  { %v1508_v33 = vmul.f32 1.050701, %v648_v30  ;;  %v590_v35 = vmul.f32 1.442695, %v578_v31  ;;  %v508_v36 = vadd.f32 %v507_v32, %v455_v29 }
 0x192   :  { %v1070_v37 = vpop.eup %1069  ;;  %672 = vst [vmem:[#allocation3 + $0x79] sm:$0xff] %v1508_v33  ;;  %1071 = vpow2.f32 %v590_v35  ;;  %v542_v38 = vmul.f32 %v1425_v23, %v508_v36 }
 0x193   :  { %v986_v39 = vadd.f32 -1.0, %v1070_v37 }
 0x194   :  { %v555_v18 = vadd.f32 %v1427_v26, %v542_v38 }
 0x195   :  { %v637_v20 = vmul.f32 1.6732632, %v986_v39 }
 0x196   :  { %v579_v41 = vmin.f32 %v555_v18, 0.0  ;;  %vm567_vm9 = vcmp.gt.f32.partialorder %v555_v18, 0.0 }
 0x197   :  { %v649_v42 = vsel %vm577_vm7, %v565_v6, %v637_v20  ;;  %v683_v6 = vld [vmem:[#allocation3 + $0x68] sm:$0xff] }
 0x198   :  { %v1072_v44 = vpop.eup %1071  ;;  %v1513_v45 = vmul.f32 1.050701, %v649_v42  ;;  %v592_v46 = vmul.f32 1.442695, %v579_v41 }
 0x199   :  { %v975_v40 = vadd.f32 -1.0, %v1072_v44  ;;  %v684_v5 = vld [vmem:[#allocation3 + $0x78] sm:$0xff] }
 0x19a   :  { %673 = vst [vmem:[#allocation3 + $0x81] sm:$0xff] %v1513_v45  ;;  %1073 = vpow2.f32 %v592_v46 }
 0x19b   :  { %v626_v47 = vmul.f32 1.6732632, %v975_v40 }
 0x19d   :  { %v638_v48 = vsel %vm566_vm8, %v554_v11, %v626_v47 }
 0x19e   :  { %v650_v49 = vmul.f32 1.050701, %v638_v48 }
 0x1a0   :  { %v1074_v23 = vpop.eup %1073  ;;  %662 = vst [vmem:[#allocation3 + $0x1] sm:$0xff] %v650_v49  ;;  %828 = vmatmul.f32.vlgmr.msrb.gmra.mxu3 %v650_v49 }
 0x1a1   :  { %v976_v26 = vadd.f32 -1.0, %v1074_v23  ;;  %v685_v7 = vld [vmem:[#allocation3 + $0x80] sm:$0xff] }
 0x1a2   :  { %v709_v8 = vld [vmem:[#allocation3 + $0x82] sm:$0xff] }
 0x1a3   :  { %v627_v50 = vmul.f32 1.6732632, %v976_v26 }
 0x1a5   :  { %v639_v52 = vsel %vm567_vm9, %v555_v18, %v627_v50 }
 0x1a6   :  { %v651_v53 = vmul.f32 1.050701, %v639_v52 }
 0x1a7   :  { %v674_v54 = vld [vmem:[#allocation3] sm:$0xff] }
 0x1a8   :  { %663 = vst [vmem:[#allocation3 + $0x9] sm:$0xff] %v651_v53  ;;  %775 = vmatmul.f32.vlgmr.msrb.gmra.mxu2 %v674_v54  ;;  %831 = vmatmul.f32.gmra.mxu3 %v651_v53 }
 0x1af   :  { %v675_v56 = vld [vmem:[#allocation3 + $0x8] sm:$0xff] }
 0x1b0   :  { %v698_v2 = vld [vmem:[#allocation3 + $0x2] sm:$0xff]  ;;  %778 = vmatmul.f32.gmra.mxu2 %v675_v56  ;;  %834 = vmatmul.f32.gmra.mxu3 %v1437_v1  ;;  %v699_v51 = vld [vmem:[#allocation3 + $0xa] sm:$0xff]  ;;  %v702_v1 = vld [vmem:[#allocation3 + $0x32] sm:$0xff] }
 0x1b1   :  { %881 = vmatmul.f32.vlgmr.msrb.gmra.mxu1 %v698_v2 }
 0x1b8   :  { %781 = vmatmul.f32.gmra.mxu2 %v676_v57  ;;  %837 = vmatmul.f32.gmra.mxu3 %v1443_v58  ;;  %v703_v58 = vld [vmem:[#allocation3 + $0x3a] sm:$0xff] }
 0x1b9   :  { %884 = vmatmul.f32.gmra.mxu1 %v699_v51 }
 0x1c0   :  { %784 = vmatmul.f32.gmra.mxu2 %v677_v59  ;;  %840 = vmatmul.f32.gmra.mxu3 %v1449_v12  ;;  %v704_v12 = vld [vmem:[#allocation3 + $0x4a] sm:$0xff] }
 0x1c1   :  { %887 = vmatmul.f32.gmra.mxu1 %v700_v60 }
 0x1c8   :  { %787 = vmatmul.f32.gmra.mxu2 %v678_v61  ;;  %843 = vmatmul.f32.gmra.mxu3 %v1457_v34  ;;  %v705_v34 = vld [vmem:[#allocation3 + $0x52] sm:$0xff] }
 0x1c9   :  { %890 = vmatmul.f32.gmra.mxu1 %v701_v62 }
 0x1d0   :  { %790 = vmatmul.f32.gmra.mxu2 %v679_v63  ;;  %846 = vmatmul.f32.gmra.mxu3 %v1466_v55  ;;  %v706_v55 = vld [vmem:[#allocation3 + $0x62] sm:$0xff] }
 0x1d1   :  { %893 = vmatmul.f32.gmra.mxu1 %v702_v1 }
 0x1d8   :  { %793 = vmatmul.f32.gmra.mxu2 %v680_v0  ;;  %849 = vmatmul.f32.gmra.mxu3 %v1477_v22  ;;  %v707_v22 = vld [vmem:[#allocation3 + $0x6a] sm:$0xff] }
 0x1d9   :  { %896 = vmatmul.f32.gmra.mxu1 %v703_v58 }
 0x1e0   :  { %796 = vmatmul.f32.gmra.mxu2 %v681_v3  ;;  %852 = vmatmul.f32.gmra.mxu3 %v1488_v43  ;;  %v708_v43 = vld [vmem:[#allocation3 + $0x7a] sm:$0xff] }
 0x1e1   :  { %899 = vmatmul.f32.gmra.mxu1 %v704_v12 }
 0x1e8   :  { %799 = vmatmul.f32.gmra.mxu2 %v682_v4  ;;  %855 = vmatmul.f32.gmra.mxu3 %v1499_v10  ;;  %v1526_v10 = vld [vmem:[#allocation9 + $0x3] ss:$0 sm:$0xff] }
 0x1e9   :  { %902 = vmatmul.f32.gmra.mxu1 %v705_v34 }
 0x1f0   :  { %802 = vmatmul.f32.gmra.mxu2 %v683_v6  ;;  %858 = vmatmul.f32.gmra.mxu3 %v1508_v33 }
 0x1f1   :  { %905 = vmatmul.f32.gmra.mxu1 %v706_v55 }
 0x1f8   :  { %805 = vmatmul.f32.gmra.mxu2 %v684_v5  ;;  %861 = vmatmul.f32.gmra.mxu3 %v1513_v45 }
 0x1f9   :  { %908 = vmatmul.f32.gmra.mxu1 %v707_v22 }
 0x200   :  { %808 = vmatmul.f32.gmra.mxu2 %v685_v7 }
 0x201   :  { %911 = vmatmul.f32.gmra.mxu1 %v708_v43 }
 0x209   :  { %914 = vmatmul.f32.gmra.mxu1 %v709_v8 }
 0x223   :  { %v829_v9 = vpop.f32.mrf.mxu3 }
 0x22b   :  { %v776_v13 = vpop.f32.mrf.mxu2  ;;  %v832_v14 = vpop.f32.mrf.mxu3 }
 0x22c   :  { %v777_v15 = vadd.f32 %v1526_v10, %v776_v13 }
 0x22e   :  { %v882_v16 = vpop.f32.mrf.mxu1  ;;  %v830_v19 = vadd.f32 %v829_v9, %v777_v15 }
 0x230   :  { %v883_v17 = vadd.f32 %v882_v16, %v830_v19 }
 0x232   :  { %918 = vst [vmem:[#allocation13] sm:$0xff] %v883_v17 }
 0x233   :  { %v779_v21 = vpop.f32.mrf.mxu2  ;;  %v835_v27 = vpop.f32.mrf.mxu3 }
 0x234   :  { %v780_v25 = vadd.f32 %v1526_v10, %v779_v21 }
 0x236   :  { %v885_v11 = vpop.f32.mrf.mxu1  ;;  %v833_v24 = vadd.f32 %v832_v14, %v780_v25 }
 0x238   :  { %v886_v28 = vadd.f32 %v885_v11, %v833_v24 }
 0x23a   :  { %919 = vst [vmem:[#allocation13 + $0x8] sm:$0xff] %v886_v28 }
 0x23b   :  { %v782_v29 = vpop.f32.mrf.mxu2  ;;  %v838_v30 = vpop.f32.mrf.mxu3 }
 0x23c   :  { %v783_v31 = vadd.f32 %v1526_v10, %v782_v29 }
 0x23e   :  { %v888_v32 = vpop.f32.mrf.mxu1  ;;  %v836_v33 = vadd.f32 %v835_v27, %v783_v31 }
 0x240   :  { %v889_v35 = vadd.f32 %v888_v32, %v836_v33 }
 0x242   :  { %920 = vst [vmem:[#allocation13 + $0x10] sm:$0xff] %v889_v35 }
 0x243   :  { %v785_v36 = vpop.f32.mrf.mxu2  ;;  %v841_v38 = vpop.f32.mrf.mxu3 }
 0x244   :  { %v786_v37 = vadd.f32 %v1526_v10, %v785_v36 }
 0x246   :  { %v891_v39 = vpop.f32.mrf.mxu1  ;;  %v839_v18 = vadd.f32 %v838_v30, %v786_v37 }
 0x248   :  { %v892_v20 = vadd.f32 %v891_v39, %v839_v18 }
 0x24a   :  { %921 = vst [vmem:[#allocation13 + $0x18] sm:$0xff] %v892_v20 }
 0x24b   :  { %v788_v41 = vpop.f32.mrf.mxu2  ;;  %v844_v44 = vpop.f32.mrf.mxu3 }
 0x24c   :  { %v789_v42 = vadd.f32 %v1526_v10, %v788_v41 }
 0x24e   :  { %v894_v45 = vpop.f32.mrf.mxu1  ;;  %v842_v46 = vadd.f32 %v841_v38, %v789_v42 }
 0x250   :  { %v895_v40 = vadd.f32 %v894_v45, %v842_v46 }
 0x252   :  { %922 = vst [vmem:[#allocation13 + $0x20] sm:$0xff] %v895_v40 }
 0x253   :  { %v791_v47 = vpop.f32.mrf.mxu2  ;;  %v847_v49 = vpop.f32.mrf.mxu3 }
 0x254   :  { %v792_v48 = vadd.f32 %v1526_v10, %v791_v47 }
 0x256   :  { %v897_v23 = vpop.f32.mrf.mxu1  ;;  %v845_v26 = vadd.f32 %v844_v44, %v792_v48 }
 0x258   :  { %v898_v50 = vadd.f32 %v897_v23, %v845_v26 }
 0x25a   :  { %923 = vst [vmem:[#allocation13 + $0x28] sm:$0xff] %v898_v50 }
 0x25b   :  { %v794_v52 = vpop.f32.mrf.mxu2  ;;  %v850_v56 = vpop.f32.mrf.mxu3 }
 0x25c   :  { %v795_v53 = vadd.f32 %v1526_v10, %v794_v52 }
 0x25e   :  { %v900_v54 = vpop.f32.mrf.mxu1  ;;  %v848_v2 = vadd.f32 %v847_v49, %v795_v53 }
 0x260   :  { %v901_v57 = vadd.f32 %v900_v54, %v848_v2 }
 0x262   :  { %924 = vst [vmem:[#allocation13 + $0x30] sm:$0xff] %v901_v57 }
 0x263   :  { %v797_v51 = vpop.f32.mrf.mxu2  ;;  %v853_v62 = vpop.f32.mrf.mxu3 }
 0x264   :  { %v798_v59 = vadd.f32 %v1526_v10, %v797_v51 }
 0x266   :  { %v903_v60 = vpop.f32.mrf.mxu1  ;;  %v851_v61 = vadd.f32 %v850_v56, %v798_v59 }
 0x268   :  { %v904_v63 = vadd.f32 %v903_v60, %v851_v61 }
 0x26a   :  { %925 = vst [vmem:[#allocation13 + $0x38] sm:$0xff] %v904_v63 }
 0x26b   :  { %v800_v1 = vpop.f32.mrf.mxu2  ;;  %v856_v4 = vpop.f32.mrf.mxu3 }
 0x26c   :  { %v801_v0 = vadd.f32 %v1526_v10, %v800_v1 }
 0x26e   :  { %v906_v58 = vpop.f32.mrf.mxu1  ;;  %v854_v3 = vadd.f32 %v853_v62, %v801_v0 }
 0x270   :  { %v907_v12 = vadd.f32 %v906_v58, %v854_v3 }
 0x272   :  { %926 = vst [vmem:[#allocation13 + $0x40] sm:$0xff] %v907_v12 }
 0x273   :  { %v803_v34 = vpop.f32.mrf.mxu2  ;;  %v859_v43 = vpop.f32.mrf.mxu3 }
 0x274   :  { %v804_v6 = vadd.f32 %v1526_v10, %v803_v34 }
 0x276   :  { %v909_v55 = vpop.f32.mrf.mxu1  ;;  %v857_v5 = vadd.f32 %v856_v4, %v804_v6 }
 0x278   :  { %v910_v22 = vadd.f32 %v909_v55, %v857_v5 }
 0x27a   :  { %927 = vst [vmem:[#allocation13 + $0x48] sm:$0xff] %v910_v22 }
 0x27b   :  { %v806_v7 = vpop.f32.mrf.mxu2  ;;  %v862_v19 = vpop.f32.mrf.mxu3 }
 0x27c   :  { %v807_v8 = vadd.f32 %v1526_v10, %v806_v7 }
 0x27e   :  { %v912_v9 = vpop.f32.mrf.mxu1  ;;  %v860_v13 = vadd.f32 %v859_v43, %v807_v8 }
 0x280   :  { %v913_v14 = vadd.f32 %v912_v9, %v860_v13 }
 0x282   :  { %928 = vst [vmem:[#allocation13 + $0x50] sm:$0xff] %v913_v14 }
 0x283   :  { %v809_v15 = vpop.f32.mrf.mxu2 }
 0x284   :  { %v810_v16 = vadd.f32 %v1526_v10, %v809_v15 }
 0x286   :  { %v863_v17 = vadd.f32 %v862_v19, %v810_v16  ;;  %v915_v21 = vpop.f32.mrf.mxu1 }
 0x288   :  { %v916_v25 = vadd.f32 %v915_v21, %v863_v17 }
 0x28a   :  { %929 = vst [vmem:[#allocation13 + $0x58] sm:$0xff] %v916_v25 }
 0x28b   :  { %942 = dma.vmem_to_hbm [thread:$0]  %s935_s17, 1536, %s937_s20, [#allocation6], %s1229_s1, %s1229_s1, %s1230_s6  }
 0x28c   :  { %1225 = dma.done.wait [#allocation6], 1536  }
 0x28d   :  { %1226 = vsyncadd [#allocation6], 4294965760 }
 0x28e   :  { %947 = vsyncpa [#allocation5], 1 }
 0x28f   :  { %948 = vsyncpa [#allocation8], 1 }
 0x290   :  { %949 = vsyncpa [#allocation11], 1 }
 0x291   :  { %950 = vsyncpa [#allocation6], 1 }

</bundles_post_ra>
